<compile_context>
chip_gen: v7x
topology: tpu7x:2x2x1
jax: 0.10.0
libtpu: 0.0.40
codegen_flags: <defaults>
</compile_context>

<pallas_src>
import functools

import jax
import jax.numpy as jnp
from jax.experimental import pallas as pl
from jax.experimental.pallas import tpu as pltpu

EPS = 1e-4  # glow-TTS attentions.LayerNorm eps


def _round_up(n, m):
    return (n + m - 1) // m * m


def _norm(h):
    # channel layernorm (channels on sublanes), one-pass statistics, no affine
    mean = jnp.mean(h, axis=0, keepdims=True)
    var = jnp.mean(h * h, axis=0, keepdims=True) - mean * mean
    return (h - mean) * jax.lax.rsqrt(var + EPS)


def _conv_same(rows, w_ref, b_ref, K, pad):
    """'same' 1-D conv of pre-masked rows [C, M] with weights w_ref [K, Cout, C].

    Tap k (offset d = k - pad) is a bare lane roll of the already-masked rows;
    the >= pad zero lanes between sequence blocks make the rolls equivalent to
    PyTorch's zero 'same' padding.  The K taps are accumulated as K MXU
    matmuls into one f32 result (no [K*C, M] concat buffer).
    """
    M = rows.shape[-1]
    acc = None
    for k in range(K):
        d = k - pad
        tap = rows if d == 0 else pltpu.roll(rows, shift=(-d) % M, axis=1)
        part = jnp.dot(w_ref[k], tap, preferred_element_type=jnp.float32)
        acc = part if acc is None else acc + part
    return acc + b_ref[...]


def dp_kernel(len_ref,                         # SMEM: scalar-prefetched lengths
              x_ref,                           # [C_in, M], mxu_dtype
              w1_ref, b1_ref, g1_ref, be1_ref,
              w2_ref, b2_ref, g2p_ref, cp_ref,
              out_ref,                         # [1, 1, M]
              *, Bt, Tp, K, mxu_dtype):
    pad = K // 2
    M = Bt * Tp
    blk = pl.program_id(0)

    # Prefix mask rebuilt once per grid step and reused for both convs and the
    # output.  Column m belongs to local sequence b = m // Tp and is valid iff
    # b*Tp <= m < b*Tp + length_b (length_b <= Tp - pad always holds).
    t = jax.lax.broadcasted_iota(jnp.int32, (1, M), 1)
    valid = jnp.zeros((1, M), jnp.bool_)
    for b in range(Bt):                        # Bt is small and static
        length_b = len_ref[blk * Bt + b]
        valid = jnp.logical_or(
            valid, jnp.logical_and(t >= b * Tp, t < b * Tp + length_b))

    # conv_1(x * mask) -> relu -> norm_1 (full affine)
    xm = jnp.where(valid, x_ref[...], 0)                           # mxu_dtype
    h = _conv_same(xm, w1_ref, b1_ref, K, pad)                     # f32 [Cf, M]
    h = jnp.maximum(h, 0.0)
    h = _norm(h) * g1_ref[...] + be1_ref[...]
    # TODO(synk): dropout is identity at inference time (p_dropout unused).

    # conv_2(h * mask) -> relu -> norm_2 (affine folded into the projection)
    hm = jnp.where(valid, h, 0.0).astype(mxu_dtype)
    h = _conv_same(hm, w2_ref, b2_ref, K, pad)
    h = jnp.maximum(h, 0.0)
    n = _norm(h)

    # proj (1x1 conv) folded with norm_2's affine:
    #   row = sum_c n_c * (g2_c * wp_c) + (sum_c wp_c * be2_c + bp)
    row = jnp.sum(n * g2p_ref[...], axis=0, keepdims=True) + cp_ref[...]
    out_ref[0] = jnp.where(valid, row, 0.0).astype(out_ref.dtype)


def duration_predictor(x, x_mask, params, kernel_size, *, block_batch=4,
                       mxu_dtype=jnp.bfloat16, vmem_limit_mb=48,
                       interpret=False):
    """x: [B, C_in, T] (NCW like PyTorch), x_mask: [B, 1, T].  Returns [B, 1, T].

    mxu_dtype=bfloat16 is the right default on v6e/v7x (f32 matmuls run as
    multi-pass bf16) and also halves the input HBM stream.  Generation-aware
    tuning:
      * v5e/v6e (128 MiB VMEM): raise block_batch and vmem_limit_mb (~64-100).
      * v7x (64 MiB VMEM, 2 TCs): keep vmem_limit_mb <= ~48 and pick
        block_batch so the grid has >= 2 steps, so both TensorCores are used.
    """
    B, C_in, T = x.shape
    K = kernel_size
    assert K % 2 == 1, "kernel_size must be odd to match PyTorch 'same' padding"
    Cf = params["b1"].shape[0]
    pad = K // 2

    Bt = max(1, min(block_batch, B))            # sequences per grid step
    # >= pad zero lanes between sequence blocks so a tap roll cannot leak the
    # neighbor sequence into a valid column; Tp stays a multiple of 128.
    Tp = _round_up(T + pad, 128)
    B_pad = _round_up(B, Bt)
    G = B_pad // Bt                             # grid steps
    M = Bt * Tp                                 # lanes per step

    # TODO(synk): assumes x_mask is a prefix (sequence-length) mask as produced
    # by glow-TTS sequence_mask; the mask is rebuilt in-kernel from lengths.
    lengths = jnp.sum(x_mask[:, 0, :] > 0, axis=-1).astype(jnp.int32)
    lengths = jnp.pad(lengths, (0, B_pad - B))  # padded sequences -> length 0

    # layout glue: [B, C, T] -> [C, B_pad * Tp]; cast once in the wrapper so
    # the per-step input DMA is half-width when mxu_dtype is bf16.
    xp = jnp.pad(x, ((0, B_pad - B), (0, 0), (0, Tp - T)))
    x_cm = jnp.transpose(xp, (1, 0, 2)).reshape(C_in, B_pad * Tp).astype(mxu_dtype)

    # weights: torch conv weight [Cout, Cin, K] -> [K, Cout, Cin] (per-tap slabs)
    w1 = jnp.transpose(params["w1"], (2, 0, 1)).astype(mxu_dtype)   # [K, Cf, C_in]
    w2 = jnp.transpose(params["w2"], (2, 0, 1)).astype(mxu_dtype)   # [K, Cf, Cf]
    col = lambda v: v.reshape(-1, 1).astype(jnp.float32)
    wp = params["wp"][0, :, 0].astype(jnp.float32)                  # [Cf]
    b1, g1, be1 = col(params["b1"]), col(params["g1"]), col(params["be1"])
    b2 = col(params["b2"])
    g2p = col(params["g2"].astype(jnp.float32) * wp)                # gamma_2 * wp
    cp = (jnp.sum(wp * params["be2"].astype(jnp.float32))
          + params["bp"].astype(jnp.float32)[0]).reshape(1, 1)      # wp.be2 + bp

    rep2 = lambda i, lens: (0, 0)               # replicated parameter blocks
    rep3 = lambda i, lens: (0, 0, 0)
    # TODO(synk): replicated parameter specs could use pipeline_mode=pl.Buffered(1)
    # to skip pointless double-buffering (VMEM headroom on v7x); left default for
    # maximum compiler compatibility.
    in_specs = [
        pl.BlockSpec((C_in, M), lambda i, lens: (0, i)),
        pl.BlockSpec(w1.shape, rep3), pl.BlockSpec(b1.shape, rep2),
        pl.BlockSpec(g1.shape, rep2), pl.BlockSpec(be1.shape, rep2),
        pl.BlockSpec(w2.shape, rep3), pl.BlockSpec(b2.shape, rep2),
        pl.BlockSpec(g2p.shape, rep2), pl.BlockSpec(cp.shape, rep2),
    ]

    kern = functools.partial(dp_kernel, Bt=Bt, Tp=Tp, K=K, mxu_dtype=mxu_dtype)
    out = pl.pallas_call(
        kern,
        out_shape=jax.ShapeDtypeStruct((G, 1, M), x.dtype),
        grid_spec=pltpu.PrefetchScalarGridSpec(
            num_scalar_prefetch=1,
            grid=(G,),
            in_specs=in_specs,
            out_specs=pl.BlockSpec((1, 1, M), lambda i, lens: (i, 0, 0)),
        ),
        compiler_params=pltpu.CompilerParams(
            dimension_semantics=("parallel",),
            vmem_limit_bytes=vmem_limit_mb * 1024 * 1024,
        ),
        interpret=interpret,
    )(lengths, x_cm, w1, b1, g1, be1, w2, b2, g2p, cp)

    out = out.reshape(B_pad, Tp)[:B, :T]         # [B, T]
    return out[:, None, :]                       # [B, 1, T]


def ref_forward(x, x_mask, p, kernel_size):
    """Pure-JAX reference with PyTorch NCW semantics."""
    pad = kernel_size // 2

    def conv1d(h, w, b, pd):
        out = jax.lax.conv_general_dilated(
            h, w, window_strides=(1,), padding=[(pd, pd)],
            dimension_numbers=("NCH", "OIH", "NCH"))
        return out + b[None, :, None]

    def layernorm(h, g, be):
        mean = jnp.mean(h, axis=1, keepdims=True)
        var = jnp.mean((h - mean) ** 2, axis=1, keepdims=True)
        return ((h - mean) * jax.lax.rsqrt(var + EPS)
                * g[None, :, None] + be[None, :, None])

    h = conv1d(x * x_mask, p["w1"], p["b1"], pad)
    h = jnp.maximum(h, 0.0)
    h = layernorm(h, p["g1"], p["be1"])
    h = conv1d(h * x_mask, p["w2"], p["b2"], pad)
    h = jnp.maximum(h, 0.0)
    h = layernorm(h, p["g2"], p["be2"])
    h = conv1d(h * x_mask, p["wp"], p["bp"], 0)
    return h * x_mask


if __name__ == "__main__":
    B, C_in, Cf, K, T = 3, 32, 32, 3, 16
    key = jax.random.PRNGKey(0)
    ks = jax.random.split(key, 12)

    params = {
        "w1": 0.1 * jax.random.normal(ks[0], (Cf, C_in, K), jnp.float32),
        "b1": 0.1 * jax.random.normal(ks[1], (Cf,), jnp.float32),
        "g1": 1.0 + 0.1 * jax.random.normal(ks[2], (Cf,), jnp.float32),
        "be1": 0.1 * jax.random.normal(ks[3], (Cf,), jnp.float32),
        "w2": 0.1 * jax.random.normal(ks[4], (Cf, Cf, K), jnp.float32),
        "b2": 0.1 * jax.random.normal(ks[5], (Cf,), jnp.float32),
        "g2": 1.0 + 0.1 * jax.random.normal(ks[6], (Cf,), jnp.float32),
        "be2": 0.1 * jax.random.normal(ks[7], (Cf,), jnp.float32),
        "wp": 0.1 * jax.random.normal(ks[8], (1, Cf, 1), jnp.float32),
        "bp": 0.1 * jax.random.normal(ks[9], (1,), jnp.float32),
    }

    x = jax.random.normal(ks[10], (B, C_in, T), jnp.float32)
    lengths = jnp.array([T, T - 5, T - 9], jnp.int32)
    x_mask = (jnp.arange(T)[None, None, :] < lengths[:, None, None]).astype(jnp.float32)

    ref = ref_forward(x, x_mask, params, K)

    # f32 MXU path: should track the pure-JAX reference tightly.
    out_f32 = jax.block_until_ready(
        duration_predictor(x, x_mask, params, K, block_batch=2,
                           mxu_dtype=jnp.float32))
    assert out_f32.shape == (B, 1, T), out_f32.shape
    assert jnp.allclose(out_f32, ref, atol=5e-4, rtol=5e-4), \
        float(jnp.max(jnp.abs(out_f32 - ref)))

    # bf16 MXU path (default): compare against a reference whose input and conv
    # weights are bf16-quantized so the tolerance stays meaningful.
    params_bf = dict(params)
    for name in ("w1", "w2"):
        params_bf[name] = params[name].astype(jnp.bfloat16).astype(jnp.float32)
    x_q = x.astype(jnp.bfloat16).astype(jnp.float32)
    ref_bf = ref_forward(x_q, x_mask, params_bf, K)

    out_bf = jax.block_until_ready(
        duration_predictor(x, x_mask, params, K, block_batch=2))
    assert out_bf.shape == (B, 1, T), out_bf.shape
    assert jnp.allclose(out_bf, ref_bf, atol=5e-2), \
        float(jnp.max(jnp.abs(out_bf - ref_bf)))

    print("KERNEL_OK")
</pallas_src>

<mosaic_0001>
module attributes {stable_mosaic.version = 11 : i64} {
  func.func @dp_kernel(%arg0: i32, %arg1: memref<4xi32, #tpu.memory_space<smem>>, %arg2: memref<32x256xf32, #tpu.memory_space<vmem>>, %arg3: memref<3x32x32xf32, #tpu.memory_space<vmem>>, %arg4: memref<32x1xf32, #tpu.memory_space<vmem>>, %arg5: memref<32x1xf32, #tpu.memory_space<vmem>>, %arg6: memref<32x1xf32, #tpu.memory_space<vmem>>, %arg7: memref<3x32x32xf32, #tpu.memory_space<vmem>>, %arg8: memref<32x1xf32, #tpu.memory_space<vmem>>, %arg9: memref<32x1xf32, #tpu.memory_space<vmem>>, %arg10: memref<1x1xf32, #tpu.memory_space<vmem>>, %arg11: memref<1x1x256xf32, #tpu.memory_space<vmem>>) attributes {dimension_semantics = [#tpu.dimension_semantics<parallel>], iteration_bounds = array<i64: 2>, scalar_prefetch = 1 : i64, scratch_operands = 0 : i64, tpu.core_type = #tpu.core_type<tc>, window_params = [{transform_indices = @transform_0, window_bounds = array<i64: 32, 256>}, {pipeline_mode = #tpu.pipeline_mode<synchronous>, transform_indices = @transform_1, window_bounds = array<i64: 3, 32, 32>}, {pipeline_mode = #tpu.pipeline_mode<synchronous>, transform_indices = @transform_2, window_bounds = array<i64: 32, 1>}, {pipeline_mode = #tpu.pipeline_mode<synchronous>, transform_indices = @transform_3, window_bounds = array<i64: 32, 1>}, {pipeline_mode = #tpu.pipeline_mode<synchronous>, transform_indices = @transform_4, window_bounds = array<i64: 32, 1>}, {pipeline_mode = #tpu.pipeline_mode<synchronous>, transform_indices = @transform_5, window_bounds = array<i64: 3, 32, 32>}, {pipeline_mode = #tpu.pipeline_mode<synchronous>, transform_indices = @transform_6, window_bounds = array<i64: 32, 1>}, {pipeline_mode = #tpu.pipeline_mode<synchronous>, transform_indices = @transform_7, window_bounds = array<i64: 32, 1>}, {pipeline_mode = #tpu.pipeline_mode<synchronous>, transform_indices = @transform_8, window_bounds = array<i64: 1, 1>}, {transform_indices = @transform_9, window_bounds = array<i64: 1, 1, 256>}]} {
    %0 = tpu.iota {dimensions = array<i32: 1>} : vector<1x256xi32>
    %false = arith.constant false
    %1 = vector.broadcast %false : i1 to vector<1x256xi1>
    %c2_i32 = arith.constant 2 : i32
    %2 = arith.muli %arg0, %c2_i32 : i32
    %c0_i32 = arith.constant 0 : i32
    %3 = arith.addi %2, %c0_i32 : i32
    %4 = arith.index_cast %3 : i32 to index
    %5 = memref.load %arg1[%4] : memref<4xi32, #tpu.memory_space<smem>>
    %c0_i32_0 = arith.constant 0 : i32
    %6 = vector.broadcast %c0_i32_0 : i32 to vector<1x256xi32>
    %7 = arith.cmpi sge, %0, %6 : vector<1x256xi32>
    %c0_i32_1 = arith.constant 0 : i32
    %8 = arith.addi %c0_i32_1, %5 : i32
    %9 = vector.broadcast %8 : i32 to vector<1x256xi32>
    %10 = arith.cmpi slt, %0, %9 : vector<1x256xi32>
    %11 = arith.andi %7, %10 : vector<1x256xi1>
    %12 = arith.ori %1, %11 : vector<1x256xi1>
    %c2_i32_2 = arith.constant 2 : i32
    %13 = arith.muli %arg0, %c2_i32_2 : i32
    %c1_i32 = arith.constant 1 : i32
    %14 = arith.addi %13, %c1_i32 : i32
    %15 = arith.index_cast %14 : i32 to index
    %16 = memref.load %arg1[%15] : memref<4xi32, #tpu.memory_space<smem>>
    %c128_i32 = arith.constant 128 : i32
    %17 = vector.broadcast %c128_i32 : i32 to vector<1x256xi32>
    %18 = arith.cmpi sge, %0, %17 : vector<1x256xi32>
    %c128_i32_3 = arith.constant 128 : i32
    %19 = arith.addi %c128_i32_3, %16 : i32
    %20 = vector.broadcast %19 : i32 to vector<1x256xi32>
    %21 = arith.cmpi slt, %0, %20 : vector<1x256xi32>
    %22 = arith.andi %18, %21 : vector<1x256xi1>
    %23 = arith.ori %12, %22 : vector<1x256xi1>
    %c0 = arith.constant 0 : index
    %c0_4 = arith.constant 0 : index
    %24 = vector.load %arg2[%c0, %c0_4] : memref<32x256xf32, #tpu.memory_space<vmem>>, vector<32x256xf32>
    %c0_i32_5 = arith.constant 0 : i32
    %25 = arith.sitofp %c0_i32_5 : i32 to f32
    %26 = vector.shape_cast %23 : vector<1x256xi1> to vector<1x256xi1>
    %27 = vector.broadcast %26 : vector<1x256xi1> to vector<32x256xi1>
    %28 = vector.broadcast %25 : f32 to vector<32x256xf32>
    %29 = arith.select %27, %24, %28 : vector<32x256xi1>, vector<32x256xf32>
    %c1_i32_6 = arith.constant 1 : i32
    %30 = tpu.dynamic_rotate %29 by %c1_i32_6 dim 1 : vector<32x256xf32>, i32 -> vector<32x256xf32>
    %c0_7 = arith.constant 0 : index
    %c0_8 = arith.constant 0 : index
    %c0_9 = arith.constant 0 : index
    %31 = vector.load %arg3[%c0_7, %c0_8, %c0_9] : memref<3x32x32xf32, #tpu.memory_space<vmem>>, vector<1x32x32xf32>
    %32 = vector.shape_cast %31 : vector<1x32x32xf32> to vector<32x32xf32>
    %cst = arith.constant dense<0.000000e+00> : vector<32x256xf32>
    %33 = tpu.matmul %32, %30, %cst {dimension_numbers = #tpu.dot_dimension_numbers<[1], [0], [0], [1], [0, 0, 1, 1], [], []>} : vector<32x32xf32>, vector<32x256xf32>, vector<32x256xf32> -> vector<32x256xf32>
    %c1 = arith.constant 1 : index
    %c0_10 = arith.constant 0 : index
    %c0_11 = arith.constant 0 : index
    %34 = vector.load %arg3[%c1, %c0_10, %c0_11] : memref<3x32x32xf32, #tpu.memory_space<vmem>>, vector<1x32x32xf32>
    %35 = vector.shape_cast %34 : vector<1x32x32xf32> to vector<32x32xf32>
    %cst_12 = arith.constant dense<0.000000e+00> : vector<32x256xf32>
    %36 = tpu.matmul %35, %29, %cst_12 {dimension_numbers = #tpu.dot_dimension_numbers<[1], [0], [0], [1], [0, 0, 1, 1], [], []>} : vector<32x32xf32>, vector<32x256xf32>, vector<32x256xf32> -> vector<32x256xf32>
    %37 = arith.addf %33, %36 : vector<32x256xf32>
    %c255_i32 = arith.constant 255 : i32
    %38 = tpu.dynamic_rotate %29 by %c255_i32 dim 1 : vector<32x256xf32>, i32 -> vector<32x256xf32>
    %c2 = arith.constant 2 : index
    %c0_13 = arith.constant 0 : index
    %c0_14 = arith.constant 0 : index
    %39 = vector.load %arg3[%c2, %c0_13, %c0_14] : memref<3x32x32xf32, #tpu.memory_space<vmem>>, vector<1x32x32xf32>
    %40 = vector.shape_cast %39 : vector<1x32x32xf32> to vector<32x32xf32>
    %cst_15 = arith.constant dense<0.000000e+00> : vector<32x256xf32>
    %41 = tpu.matmul %40, %38, %cst_15 {dimension_numbers = #tpu.dot_dimension_numbers<[1], [0], [0], [1], [0, 0, 1, 1], [], []>} : vector<32x32xf32>, vector<32x256xf32>, vector<32x256xf32> -> vector<32x256xf32>
    %42 = arith.addf %37, %41 : vector<32x256xf32>
    %c0_16 = arith.constant 0 : index
    %c0_17 = arith.constant 0 : index
    %43 = vector.load %arg4[%c0_16, %c0_17] : memref<32x1xf32, #tpu.memory_space<vmem>>, vector<32x1xf32>
    %44 = vector.broadcast %43 : vector<32x1xf32> to vector<32x256xf32>
    %45 = arith.addf %42, %44 : vector<32x256xf32>
    %cst_18 = arith.constant 0.000000e+00 : f32
    %46 = vector.broadcast %cst_18 : f32 to vector<32x256xf32>
    %47 = arith.maximumf %45, %46 : vector<32x256xf32>
    %cst_19 = arith.constant dense<0.000000e+00> : vector<256xf32>
    %48 = vector.multi_reduction <add>, %47, %cst_19 [0] : vector<32x256xf32> to vector<256xf32>
    %49 = vector.shape_cast %48 : vector<256xf32> to vector<1x256xf32>
    %cst_20 = arith.constant 3.200000e+01 : f32
    %50 = vector.broadcast %cst_20 : f32 to vector<1x256xf32>
    %51 = arith.divf %49, %50 : vector<1x256xf32>
    %52 = arith.mulf %47, %47 : vector<32x256xf32>
    %cst_21 = arith.constant dense<0.000000e+00> : vector<256xf32>
    %53 = vector.multi_reduction <add>, %52, %cst_21 [0] : vector<32x256xf32> to vector<256xf32>
    %54 = vector.shape_cast %53 : vector<256xf32> to vector<1x256xf32>
    %cst_22 = arith.constant 3.200000e+01 : f32
    %55 = vector.broadcast %cst_22 : f32 to vector<1x256xf32>
    %56 = arith.divf %54, %55 : vector<1x256xf32>
    %57 = arith.mulf %51, %51 : vector<1x256xf32>
    %58 = arith.subf %56, %57 : vector<1x256xf32>
    %59 = vector.broadcast %51 : vector<1x256xf32> to vector<32x256xf32>
    %60 = arith.subf %47, %59 : vector<32x256xf32>
    %cst_23 = arith.constant 9.99999974E-5 : f32
    %61 = vector.broadcast %cst_23 : f32 to vector<1x256xf32>
    %62 = arith.addf %58, %61 : vector<1x256xf32>
    %63 = math.rsqrt %62 : vector<1x256xf32>
    %64 = vector.broadcast %63 : vector<1x256xf32> to vector<32x256xf32>
    %65 = arith.mulf %60, %64 : vector<32x256xf32>
    %c0_24 = arith.constant 0 : index
    %c0_25 = arith.constant 0 : index
    %66 = vector.load %arg5[%c0_24, %c0_25] : memref<32x1xf32, #tpu.memory_space<vmem>>, vector<32x1xf32>
    %67 = vector.broadcast %66 : vector<32x1xf32> to vector<32x256xf32>
    %68 = arith.mulf %65, %67 : vector<32x256xf32>
    %c0_26 = arith.constant 0 : index
    %c0_27 = arith.constant 0 : index
    %69 = vector.load %arg6[%c0_26, %c0_27] : memref<32x1xf32, #tpu.memory_space<vmem>>, vector<32x1xf32>
    %70 = vector.broadcast %69 : vector<32x1xf32> to vector<32x256xf32>
    %71 = arith.addf %68, %70 : vector<32x256xf32>
    %cst_28 = arith.constant 0.000000e+00 : f32
    %72 = vector.shape_cast %23 : vector<1x256xi1> to vector<1x256xi1>
    %73 = vector.broadcast %72 : vector<1x256xi1> to vector<32x256xi1>
    %74 = vector.broadcast %cst_28 : f32 to vector<32x256xf32>
    %75 = arith.select %73, %71, %74 : vector<32x256xi1>, vector<32x256xf32>
    %c1_i32_29 = arith.constant 1 : i32
    %76 = tpu.dynamic_rotate %75 by %c1_i32_29 dim 1 : vector<32x256xf32>, i32 -> vector<32x256xf32>
    %c0_30 = arith.constant 0 : index
    %c0_31 = arith.constant 0 : index
    %c0_32 = arith.constant 0 : index
    %77 = vector.load %arg7[%c0_30, %c0_31, %c0_32] : memref<3x32x32xf32, #tpu.memory_space<vmem>>, vector<1x32x32xf32>
    %78 = vector.shape_cast %77 : vector<1x32x32xf32> to vector<32x32xf32>
    %cst_33 = arith.constant dense<0.000000e+00> : vector<32x256xf32>
    %79 = tpu.matmul %78, %76, %cst_33 {dimension_numbers = #tpu.dot_dimension_numbers<[1], [0], [0], [1], [0, 0, 1, 1], [], []>} : vector<32x32xf32>, vector<32x256xf32>, vector<32x256xf32> -> vector<32x256xf32>
    %c1_34 = arith.constant 1 : index
    %c0_35 = arith.constant 0 : index
    %c0_36 = arith.constant 0 : index
    %80 = vector.load %arg7[%c1_34, %c0_35, %c0_36] : memref<3x32x32xf32, #tpu.memory_space<vmem>>, vector<1x32x32xf32>
    %81 = vector.shape_cast %80 : vector<1x32x32xf32> to vector<32x32xf32>
    %cst_37 = arith.constant dense<0.000000e+00> : vector<32x256xf32>
    %82 = tpu.matmul %81, %75, %cst_37 {dimension_numbers = #tpu.dot_dimension_numbers<[1], [0], [0], [1], [0, 0, 1, 1], [], []>} : vector<32x32xf32>, vector<32x256xf32>, vector<32x256xf32> -> vector<32x256xf32>
    %83 = arith.addf %79, %82 : vector<32x256xf32>
    %c255_i32_38 = arith.constant 255 : i32
    %84 = tpu.dynamic_rotate %75 by %c255_i32_38 dim 1 : vector<32x256xf32>, i32 -> vector<32x256xf32>
    %c2_39 = arith.constant 2 : index
    %c0_40 = arith.constant 0 : index
    %c0_41 = arith.constant 0 : index
    %85 = vector.load %arg7[%c2_39, %c0_40, %c0_41] : memref<3x32x32xf32, #tpu.memory_space<vmem>>, vector<1x32x32xf32>
    %86 = vector.shape_cast %85 : vector<1x32x32xf32> to vector<32x32xf32>
    %cst_42 = arith.constant dense<0.000000e+00> : vector<32x256xf32>
    %87 = tpu.matmul %86, %84, %cst_42 {dimension_numbers = #tpu.dot_dimension_numbers<[1], [0], [0], [1], [0, 0, 1, 1], [], []>} : vector<32x32xf32>, vector<32x256xf32>, vector<32x256xf32> -> vector<32x256xf32>
    %88 = arith.addf %83, %87 : vector<32x256xf32>
    %c0_43 = arith.constant 0 : index
    %c0_44 = arith.constant 0 : index
    %89 = vector.load %arg8[%c0_43, %c0_44] : memref<32x1xf32, #tpu.memory_space<vmem>>, vector<32x1xf32>
    %90 = vector.broadcast %89 : vector<32x1xf32> to vector<32x256xf32>
    %91 = arith.addf %88, %90 : vector<32x256xf32>
    %cst_45 = arith.constant 0.000000e+00 : f32
    %92 = vector.broadcast %cst_45 : f32 to vector<32x256xf32>
    %93 = arith.maximumf %91, %92 : vector<32x256xf32>
    %cst_46 = arith.constant dense<0.000000e+00> : vector<256xf32>
    %94 = vector.multi_reduction <add>, %93, %cst_46 [0] : vector<32x256xf32> to vector<256xf32>
    %95 = vector.shape_cast %94 : vector<256xf32> to vector<1x256xf32>
    %cst_47 = arith.constant 3.200000e+01 : f32
    %96 = vector.broadcast %cst_47 : f32 to vector<1x256xf32>
    %97 = arith.divf %95, %96 : vector<1x256xf32>
    %98 = arith.mulf %93, %93 : vector<32x256xf32>
    %cst_48 = arith.constant dense<0.000000e+00> : vector<256xf32>
    %99 = vector.multi_reduction <add>, %98, %cst_48 [0] : vector<32x256xf32> to vector<256xf32>
    %100 = vector.shape_cast %99 : vector<256xf32> to vector<1x256xf32>
    %cst_49 = arith.constant 3.200000e+01 : f32
    %101 = vector.broadcast %cst_49 : f32 to vector<1x256xf32>
    %102 = arith.divf %100, %101 : vector<1x256xf32>
    %103 = arith.mulf %97, %97 : vector<1x256xf32>
    %104 = arith.subf %102, %103 : vector<1x256xf32>
    %105 = vector.broadcast %97 : vector<1x256xf32> to vector<32x256xf32>
    %106 = arith.subf %93, %105 : vector<32x256xf32>
    %cst_50 = arith.constant 9.99999974E-5 : f32
    %107 = vector.broadcast %cst_50 : f32 to vector<1x256xf32>
    %108 = arith.addf %104, %107 : vector<1x256xf32>
    %109 = math.rsqrt %108 : vector<1x256xf32>
    %110 = vector.broadcast %109 : vector<1x256xf32> to vector<32x256xf32>
    %111 = arith.mulf %106, %110 : vector<32x256xf32>
    %c0_51 = arith.constant 0 : index
    %c0_52 = arith.constant 0 : index
    %112 = vector.load %arg9[%c0_51, %c0_52] : memref<32x1xf32, #tpu.memory_space<vmem>>, vector<32x1xf32>
    %113 = vector.broadcast %112 : vector<32x1xf32> to vector<32x256xf32>
    %114 = arith.mulf %111, %113 : vector<32x256xf32>
    %cst_53 = arith.constant dense<0.000000e+00> : vector<256xf32>
    %115 = vector.multi_reduction <add>, %114, %cst_53 [0] : vector<32x256xf32> to vector<256xf32>
    %116 = vector.shape_cast %115 : vector<256xf32> to vector<1x256xf32>
    %c0_54 = arith.constant 0 : index
    %c0_55 = arith.constant 0 : index
    %117 = vector.load %arg10[%c0_54, %c0_55] : memref<1x1xf32, #tpu.memory_space<vmem>>, vector<1x1xf32>
    %118 = vector.broadcast %117 : vector<1x1xf32> to vector<1x256xf32>
    %119 = arith.addf %116, %118 : vector<1x256xf32>
    %cst_56 = arith.constant 0.000000e+00 : f32
    %120 = vector.broadcast %cst_56 : f32 to vector<1x256xf32>
    %121 = arith.select %23, %119, %120 : vector<1x256xi1>, vector<1x256xf32>
    %c0_57 = arith.constant 0 : index
    %c0_58 = arith.constant 0 : index
    %c0_59 = arith.constant 0 : index
    %122 = vector.load %arg11[%c0_57, %c0_58, %c0_59] : memref<1x1x256xf32, #tpu.memory_space<vmem>>, vector<1x1x256xf32>
    %123 = vector.shape_cast %122 : vector<1x1x256xf32> to vector<1x256xf32>
    %124 = vector.shape_cast %121 : vector<1x256xf32> to vector<1x1x256xf32>
    tpu.vector_store %arg11[%c0_57, %c0_58, %c0_59], %124 {strides = array<i32>} : memref<1x1x256xf32, #tpu.memory_space<vmem>>, vector<1x1x256xf32>,
    return
  }
  func.func @transform_0(%arg0: i32, %arg1: memref<4xi32, #tpu.memory_space<smem>>) -> (i32, i32) {
    %c0_i32 = arith.constant 0 : i32
    %c0_i32_0 = arith.constant 0 : i32
    return %c0_i32, %arg0 : i32, i32
  }
  func.func @transform_1(%arg0: i32, %arg1: memref<4xi32, #tpu.memory_space<smem>>) -> (i32, i32, i32) {
    %c0_i32 = arith.constant 0 : i32
    %c0_i32_0 = arith.constant 0 : i32
    %c0_i32_1 = arith.constant 0 : i32
    %c0_i32_2 = arith.constant 0 : i32
    return %c0_i32, %c0_i32_0, %c0_i32_1 : i32, i32, i32
  }
  func.func @transform_2(%arg0: i32, %arg1: memref<4xi32, #tpu.memory_space<smem>>) -> (i32, i32) {
    %c0_i32 = arith.constant 0 : i32
    %c0_i32_0 = arith.constant 0 : i32
    %c0_i32_1 = arith.constant 0 : i32
    return %c0_i32, %c0_i32_0 : i32, i32
  }
  func.func @transform_3(%arg0: i32, %arg1: memref<4xi32, #tpu.memory_space<smem>>) -> (i32, i32) {
    %c0_i32 = arith.constant 0 : i32
    %c0_i32_0 = arith.constant 0 : i32
    %c0_i32_1 = arith.constant 0 : i32
    return %c0_i32, %c0_i32_0 : i32, i32
  }
  func.func @transform_4(%arg0: i32, %arg1: memref<4xi32, #tpu.memory_space<smem>>) -> (i32, i32) {
    %c0_i32 = arith.constant 0 : i32
    %c0_i32_0 = arith.constant 0 : i32
    %c0_i32_1 = arith.constant 0 : i32
    return %c0_i32, %c0_i32_0 : i32, i32
  }
  func.func @transform_5(%arg0: i32, %arg1: memref<4xi32, #tpu.memory_space<smem>>) -> (i32, i32, i32) {
    %c0_i32 = arith.constant 0 : i32
    %c0_i32_0 = arith.constant 0 : i32
    %c0_i32_1 = arith.constant 0 : i32
    %c0_i32_2 = arith.constant 0 : i32
    return %c0_i32, %c0_i32_0, %c0_i32_1 : i32, i32, i32
  }
  func.func @transform_6(%arg0: i32, %arg1: memref<4xi32, #tpu.memory_space<smem>>) -> (i32, i32) {
    %c0_i32 = arith.constant 0 : i32
    %c0_i32_0 = arith.constant 0 : i32
    %c0_i32_1 = arith.constant 0 : i32
    return %c0_i32, %c0_i32_0 : i32, i32
  }
  func.func @transform_7(%arg0: i32, %arg1: memref<4xi32, #tpu.memory_space<smem>>) -> (i32, i32) {
    %c0_i32 = arith.constant 0 : i32
    %c0_i32_0 = arith.constant 0 : i32
    %c0_i32_1 = arith.constant 0 : i32
    return %c0_i32, %c0_i32_0 : i32, i32
  }
  func.func @transform_8(%arg0: i32, %arg1: memref<4xi32, #tpu.memory_space<smem>>) -> (i32, i32) {
    %c0_i32 = arith.constant 0 : i32
    %c0_i32_0 = arith.constant 0 : i32
    %c0_i32_1 = arith.constant 0 : i32
    return %c0_i32, %c0_i32_0 : i32, i32
  }
  func.func @transform_9(%arg0: i32, %arg1: memref<4xi32, #tpu.memory_space<smem>>) -> (i32, i32, i32) {
    %c0_i32 = arith.constant 0 : i32
    %c0_i32_0 = arith.constant 0 : i32
    %c0_i32_1 = arith.constant 0 : i32
    return %arg0, %c0_i32, %c0_i32_0 : i32, i32, i32
  }
}

</mosaic_0001>

<bundles_post_ra>
// kernel: tpu_custom_call.1
= control target key start
LH: loop header
LB: loop body
LE: loop exit
PB: predicated region body
PF: predicated region fallthrough
CT: control target
= control target key end

     0   :  { %s2765_s0 = inlined_call_operand.vmem [shape: s32[4], index: 0, kind: input, shape index: {}]   ;;  %s2766_s1 = inlined_call_operand.vmem [shape: f32[32,512], index: 1, kind: input, shape index: {}]   ;;  %s2767_s2 = inlined_call_operand.hbm [shape: f32[3,32,32], index: 2, kind: input, shape index: {}]   ;;  %s2768_s3 = inlined_call_operand.vmem [shape: f32[32,1], index: 3, kind: input, shape index: {}]   ;;  %s2769_s4 = inlined_call_operand.vmem [shape: f32[32,1], index: 4, kind: input, shape index: {}]   ;;  %s2770_s5 = inlined_call_operand.vmem [shape: f32[32,1], index: 5, kind: input, shape index: {}]   ;;  %s2771_s6 = inlined_call_operand.hbm [shape: f32[3,32,32], index: 6, kind: input, shape index: {}]   ;;  %s2772_s7 = inlined_call_operand.vmem [shape: f32[32,1], index: 7, kind: input, shape index: {}]   ;;  %s2773_s8 = inlined_call_operand.vmem [shape: f32[32,1], index: 8, kind: input, shape index: {}]   ;;  %s2774_s10 = inlined_call_operand.hbm [shape: f32[2,1,256], index: 10, kind: output, shape index: {}]   ;;  %s2775_s9 = inlined_call_operand.<no memory space> [shape: f32[1,1], index: 9, kind: input, shape index: {}]  }
   0x1   :  { %s15_s15 = sshll.u32 %s2765_s0, 4  ;;  %v19_v0 = vstv %s2775_s9  ;;  %s16_s15 = int_to_ptr.vmem [resolvable:$true] %s15_s15 }
   0x2   :  { %20 = vst [vmem:[#allocation4] sm:$0x1] %v19_v0  ;;  %s1991_s18 = scalar_lea.vmem %s16_s15, 16  ;;  %p1996_p1 = scmp.lt.s32.totalorder %s16_s15, %s16_s15 }
   0x3   :  { %p1992_p0 = scmp.ne.s32.totalorder %s16_s15, %s1991_s18  ;;  %p1997_p2 = scmp.lt.s32.totalorder %s1991_s18, %s1991_s18 }
   0x5   :  { %p1998_p3 = por %p1997_p2, %p1996_p1 }
   0x7   :  { %p1999_p4 = pnand %p1998_p3, %p1992_p0 }
   0x9   :  { %2002 = shalt.err (!%p1999_p4)  }
   0xa   :  { %s2133_s19 = smov [#allocation3]  }
   0xb   :  { %18 = dma.vmem_to_smem %s16_s15, 16, %s2133_s19, [#allocation2] }
   0xc   :  { %2103 = dma.done.wait [#allocation2], 16 }
   0xd   :  { %2104 = vsyncadd [#allocation2], 4294967280 }
   0xe   :  { %22 = sfence }
   0xf   :  { %23 = vsyncpa [#allocation7], 0 }
  0x10   :  { %24 = vsyncpa [#allocation10], 0 }
  0x11   :  { %25 = vsyncpa [#allocation8], 0 }
  0x12   :  { %27 = vsyncpa [#allocation8 + $0x1], 0  ;;  %s2205_s0 = smov 0   ;;  %s2207_s9 = smov 0  }
  0x13   :  { %s2209_s20 = smov 0   ;;  %s2211_s21 = smov 0  }
  0x14 LB: > { %s2226_s22 = sadd.s32 4294967295, %s2131_s21   ;;  %s1684_s23 = sadd.s32 4294967294, %s2131_s21   ;;  %s2131_s21 = sphi %s2211_s21, %s2809_s21   ;;  %s2127_s20 = sphi %s2209_s20, %s2813_s20   ;;  %s2123_s9 = sphi %s2207_s9, %s2812_s9   ;;  %s2119_s0 = sphi %s2205_s0, %s2811_s0  }
  0x15   : > { %s2230_s24 = sadd.s32 1, %s2131_s21   ;;  %s40_s25 = sadd.s32 1, %s2127_s20 }
  0x16   : > { %2782 = sst [smem:[#allocation16_spill]] %s2230_s24  ;;  %s37_s26 = ssub.s32 %s2131_s21, %s2230_s24 }
  0x17   : > { %p47_p5 = scmp.ne.s32.totalorder %s2127_s20, %s2123_s9  ;;  %p38_p6 = scmp.eq.s32.totalorder %s37_s26, 0 }
  0x18   : > { %p48_p7 = scmp.eq.s32.totalorder %s2131_s21, 0  ;;  %p245_p8 = scmp.eq.s32.totalorder %s2226_s22, 1 }
  0x19   : > { %p250_p9 = scmp.ne.s32.totalorder %s2123_s9, %s2119_s0  ;;  %p251_p12 = scmp.eq.s32.totalorder %s1684_s23, 1 }
  0x1a   : > { %s2242_s27 = scalar_select %p38_p6, %s2127_s20, %s40_s25  }
  0x1b   : > { %p2244_p10 = por %p48_p7, %p47_p5  ;;  %p2248_p11 = por %p245_p8, %p47_p5 }
  0x1c   : > { %2783 = sst [smem:[#allocation17_spill]] %s2242_s27  ;;  %p1685_p13 = scmp.ge.s32.totalorder %s2131_s21, 1 }
  0x1d   : > { %s2784_s28 = scalar_select %p2244_p10, 1, 0 }
  0x1e   : > { %s2785_s29 = scalar_select %p2248_p11, 1, 0 }
  0x1f   : > { %p258_p0 = scmp.lt.s32.totalorder %s2131_s21, 3  ;;  %p2254_p1 = por %p251_p12, %p250_p9 }
  0x20   : > { %p2776_p2 = scmp.eq.s32.totalorder %s2226_s22, 0  ;;  %s2134_s12 = smov [#allocation6]  }
  0x21   : > { %s2786_s30 = scalar_select %p2254_p1, 1, 0 }
  0x22   : > { %p2259_p3 = pnand %p1685_p13, %p258_p0  ;;  %s270_s13 = sshll.u32 %s2134_s12, 4  ;;  %s271_s13 = int_to_ptr.vmem [resolvable:$true] %s270_s13 }
  0x23   : > { %2787 = sst [smem:[#allocation18_spill]] %s2786_s30  ;;  %s2135_s15 = smov [#allocation9]  }
  0x24   : > { %s2788_s11 = scalar_select %p2259_p3, 1, 0 }
  0x25   : > { %p1843_p4 = pneg %p2259_p3  ;;  %s292_s16 = sshll.u32 %s2135_s15, 4  ;;  %s2271_s16 = int_to_ptr.vmem [resolvable:$true] %s292_s16 }
  0x26   : > { %s2003_s19 = scalar_lea.hbm %s2767_s2, 1536 }
  0x27   : > { %p2267_p5 = pnand %p2776_p2, %p1843_p4  ;;  %p2004_p6 = scmp.ne.s32.totalorder %s2767_s2, %s2003_s19 }
  0x28   : > { %p2010_p12 = scmp.lt.u32.totalorder %s2003_s19, %s2767_s2 }
  0x29   : > { %p2005_p7 = pneg %p2267_p5 }
  0x2b   : > { %p2006_p8 = pnand %p2005_p7, %p2004_p6 }
  0x2d   : > { %p2007_p9 = pneg %p2006_p8 }
  0x2f   : > { %p2012_p13 = pnand %p2010_p12, %p2007_p9 }
  0x31   : > { %2015 = shalt.err (!%p2012_p13)
}
  0x32   : > { %s2016_s15 = scalar_lea.vmem %s271_s13, 1536  ;;  %p2024_p1 = scmp.lt.s32.totalorder %s271_s13, %s271_s13 }
  0x33   : > { %p2017_p0 = scmp.ne.s32.totalorder %s271_s13, %s2016_s15  ;;  %p2025_p11 = scmp.lt.s32.totalorder %s2016_s15, %s2016_s15 }
  0x35   : > { %p2019_p4 = pnand %p2017_p0, %p2005_p7  ;;  %p2026_p3 = por %p2025_p11, %p2024_p1 }
  0x37   : > { %p2020_p2 = pneg %p2019_p4 }
  0x39   : > { %p2027_p10 = pnand %p2026_p3, %p2020_p2 }
  0x3b   : > { %2030 = shalt.err (!%p2027_p10)
}
  0x3c   : > { %s2136_s17 = smov 128   ;;  %s2137_s18 = smov 8  }
  0x3d   : > { %1846 = dma.hbm_to_vmem [thread:$0]  (!%p2267_p5), %s2767_s2, 1536, %s271_s13, [#allocation7], %s2136_s17, %s2136_s17, %s2137_s18  }
  0x3e   : > { %s2031_s12 = scalar_lea.hbm %s2771_s6, 1536 }
  0x3f   : > { %p2032_p6 = scmp.ne.s32.totalorder %s2771_s6, %s2031_s12  ;;  %p2038_p1 = scmp.lt.u32.totalorder %s2031_s12, %s2771_s6 }
  0x41   : > { %p2034_p10 = pnand %p2032_p6, %p2005_p7 }
  0x43   : > { %p2035_p11 = pneg %p2034_p10 }
  0x45   : > { %p2040_p2 = pnand %p2038_p1, %p2035_p11 }
  0x47   : > { %2043 = shalt.err (!%p2040_p2)
}
  0x48   : > { %s2044_s13 = scalar_lea.vmem %s2271_s16, 1536  ;;  %p2052_p12 = scmp.lt.s32.totalorder %s2271_s16, %s2271_s16 }
  0x49   : > { %p2045_p3 = scmp.ne.s32.totalorder %s2271_s16, %s2044_s13  ;;  %p2053_p13 = scmp.lt.s32.totalorder %s2044_s13, %s2044_s13 }
  0x4b   : > { %p2047_p8 = pnand %p2045_p3, %p2005_p7  ;;  %p2054_p0 = por %p2053_p13, %p2052_p12 }
  0x4d   : > { %p2048_p9 = pneg %p2047_p8 }
  0x4f   : > { %p2055_p4 = pnand %p2054_p0, %p2048_p9 }
  0x51   : > { %2058 = shalt.err (!%p2055_p4)
}
  0x52   : > { %1849 = dma.hbm_to_vmem [thread:$0]  (!%p2267_p5), %s2771_s6, 1536, %s2271_s16, [#allocation10], %s2136_s17, %s2136_s17, %s2137_s18  }
  0x53   : > { %p1688_p6 = scmp.ge.s32.totalorder %s2131_s21, 2 }
  0x54   : > { %p2790_p7 = scmp.ne.s32.totalorder (!%p1688_p6), %s2784_s28, 0 }
  0x55   : > { %311 = sbr.rel (%p1688_p6) target bundleno = 100 (0x64), region = 48 }
  0x5c   : > { %314 = sbr.rel (!%p2790_p7) target bundleno = 100 (0x64), region = 52  ;;  %s316_s30 = sand.u32 (%p2790_p7), 1, %s2127_s20  }
  0x5d   : > { %s1743_s19 = sshll.u32 (%p2790_p7), %s2131_s21, 4  ;;  %s1689_s23 = sshll.u32 (%p2790_p7), %s316_s30, 6 }
  0x5e   : > { %s321_s26 = scalar_lea.vmem (%p2790_p7), %s2766_s1, %s1743_s19  ;;  %s318_s16 = scalar_lea.vmem (%p2790_p7), [#allocation5], %s1689_s23 }
  0x5f   : > { %v334_v1 = vld [vmem:[%s321_s26] sm:$0xff] (%p2790_p7)  ;;  %v336_v2 = vld [vmem:[%s321_s26 + $0x8] sm:$0xff] (%p2790_p7) }
  0x60   : > { %v338_v3 = vld [vmem:[%s321_s26 + $0x20] sm:$0xff] (%p2790_p7)  ;;  %335 = vst [vmem:[%s318_s16] sm:$0xff] (%p2790_p7), %v334_v1  ;;  %337 = vst [vmem:[%s318_s16 + $0x8] sm:$0xff] (%p2790_p7), %v336_v2  ;;  %v340_v4 = vld [vmem:[%s321_s26 + $0x28] sm:$0xff] (%p2790_p7) }
  0x61   : > { %339 = vst [vmem:[%s318_s16 + $0x10] sm:$0xff] (%p2790_p7), %v338_v3  ;;  %v342_v5 = vld [vmem:[%s321_s26 + $0x40] sm:$0xff] (%p2790_p7)  ;;  %v344_v6 = vld [vmem:[%s321_s26 + $0x48] sm:$0xff] (%p2790_p7)  ;;  %341 = vst [vmem:[%s318_s16 + $0x18] sm:$0xff] (%p2790_p7), %v340_v4 }
  0x62   : > { %343 = vst [vmem:[%s318_s16 + $0x20] sm:$0xff] (%p2790_p7), %v342_v5  ;;  %345 = vst [vmem:[%s318_s16 + $0x28] sm:$0xff] (%p2790_p7), %v344_v6  ;;  %v346_v7 = vld [vmem:[%s321_s26 + $0x60] sm:$0xff] (%p2790_p7)  ;;  %v348_v8 = vld [vmem:[%s321_s26 + $0x68] sm:$0xff] (%p2790_p7) }
  0x63   : > { %347 = vst [vmem:[%s318_s16 + $0x30] sm:$0xff] %v346_v7  ;;  %349 = vst [vmem:[%s318_s16 + $0x38] sm:$0xff] %v348_v8 }
  0x64 PF: > { %p2791_p5 = scmp.ne.s32.totalorder %s2788_s11, 0 }
  0x65   : > { %s2333_s28 = sand.u32 (!%p2791_p5), 1, %s2123_s9   ;;  %p2792_p10 = scmp.eq.s32.totalorder (!%p2791_p5), %s2226_s22, 0 }
  0x66   : > { %358 = sbr.rel (%p2791_p5) target bundleno = 995 (0x3e3), region = 75  ;;  %s1693_s17 = sshll.u32 (!%p2791_p5), %s2333_s28, 6 }
  0x67   : > { %s2336_s18 = scalar_lea.vmem (!%p2791_p5), [#allocation5], %s1693_s17 }
  0x6d   : > { %2106 = dma.done.wait (%p2792_p10), [#allocation7], 1536   ;;  %p2793_p11 = pmov %p2792_p10 }
  0x6e   : > { %p2794_p1 = pmov %p2792_p10 }
  0x6f   : > { %2108 = vsyncadd (%p2793_p11), [#allocation7], 4294965760 }
  0x70   : > { %2110 = dma.done.wait (%p2794_p1), [#allocation10], 1536   ;;  %p2795_p2 = pmov %p2794_p1 }
  0x71   : > { %v405_v9 = vlaneseq  ;;  %s1697_s11 = sshll.u32 %s2226_s22, 1  ;;  %v2138_v10 = vmov 0.0   ;;  %v433_v14 = vld [vmem:[%s2336_s18 + $0x20] sm:$0xff]  ;;  %v435_v15 = vld [vmem:[%s2336_s18 + $0x30] sm:$0xff]  ;;  %v430_v26 = vld [vmem:[%s2336_s18 + $0x8] sm:$0xff]  ;;  %s2139_s27 = smov 1  }
  0x72   : > { %2112 = vsyncadd (%p2795_p2), [#allocation10], 4294965760  ;;  %s409_s12 = sld [smem:[#allocation3 + %s1697_s11]]  ;;  %s417_s15 = sadd.s32 1, %s1697_s11  ;;  %560 = vmatprep.mubr.f32.mxu0 %v2138_v10  ;;  %1119 = vmatprep.mubr.f32.mxu1 %v2138_v10  ;;  %v429_v16 = vld [vmem:[%s2336_s18] sm:$0xff]  ;;  %v431_v18 = vld [vmem:[%s2336_s18 + $0x10] sm:$0xff]  ;;  %v1754_v43 = vpack.c.bf16 %v435_v15, %v433_v14 }
  0x73   : > { %v2350_v11 = vand.u32 127, %v405_v9  ;;  %s418_s13 = sld [smem:[#allocation3 + %s417_s15]]  ;;  %v432_v27 = vld [vmem:[%s2336_s18 + $0x18] sm:$0xff]  ;;  %v434_v29 = vld [vmem:[%s2336_s18 + $0x28] sm:$0xff]  ;;  %v1748_v32 = vpack.c.bf16 %v431_v18, %v429_v16  ;;  %v479_v44 = vld [vmem:[#allocation6 + $0x20] sm:$0xff]  ;;  %vm483_vm6 = vcmask 261120  }
  0x74   : > { %v436_v30 = vld [vmem:[%s2336_s18 + $0x38] sm:$0xff]  ;;  %v1745_v31 = vpack.c.bf16 %v432_v27, %v430_v26  ;;  %s2140_s30 = smov 127   ;;  %v480_v45 = vld [vmem:[#allocation6 + $0x28] sm:$0xff]  ;;  %v481_v46 = vld [vmem:[#allocation6 + $0x30] sm:$0xff]  ;;  %v2141_v50 = vmov 0   ;;  %vm1579_vm9 = vcmp.lt.s32.totalorder %v405_v9, 256 }
  0x75   : > { %v407_v12 = vadd.s32 128, %v2350_v11  ;;  %v1751_v35 = vpack.c.bf16 %v436_v30, %v434_v29  ;;  %v482_v47 = vld [vmem:[#allocation6 + $0x38] sm:$0xff]  ;;  %v826_v48 = vld [vmem:[%s2768_s3 + $0x8] sm:$0xff]  ;;  %1942 = vset.pattern.permute.xlu1 %v2141_v50  ;;  %1941 = vset.pattern.permute.xlu0 %v2141_v50  ;;  %v827_v51 = vld [vmem:[%s2768_s3 + $0x10] sm:$0xff]  ;;  %vm465_vm7 = vcmp.lt.s32.totalorder %v2350_v11, 1  ;;  %vm702_vm8 = vcmp.lt.s32.totalorder %v2350_v11, 127 }
  0x76   : > { %v825_v49 = vld [vmem:[%s2768_s3] sm:$0xff]  ;;  %v828_v52 = vld [vmem:[%s2768_s3 + $0x18] sm:$0xff]  ;;  %v939_v54 = vld [vmem:[%s2769_s4 + $0x8] sm:$0xff]  ;;  %s1583_s26 = scalar_lea.sflag [#allocation8], %s2333_s28  ;;  %p2806_p8 = scmp.ne.s32.totalorder %s2785_s29, 0 }
  0x77   : > { %v938_v53 = vld [vmem:[%s2769_s4] sm:$0xff]  ;;  %v971_v56 = vld [vmem:[%s2770_s5 + $0x8] sm:$0xff]  ;;  %v940_v57 = vld [vmem:[%s2769_s4 + $0x10] sm:$0xff] }
  0x78   : > { %v412_v13 = vstv %s409_s12  ;;  %v970_v55 = vld [vmem:[%s2770_s5] sm:$0xff]  ;;  %v941_v58 = vld [vmem:[%s2769_s4 + $0x18] sm:$0xff]  ;;  %v972_v59 = vld [vmem:[%s2770_s5 + $0x10] sm:$0xff] }
  0x79   : > { %vm2357_vm0 = vcmp.lt.s32.totalorder %v2350_v11, %v412_v13  ;;  %s421_s24 = sadd.s32 128, %s418_s13  ;;  %vm2370_vm1 = vcmp.lt.s32.totalorder %v407_v12, %v412_v13  ;;  %v973_v60 = vld [vmem:[%s2770_s5 + $0x18] sm:$0xff]  ;;  %v1383_v33 = vld [vmem:[%s2772_s7] sm:$0xff]  ;;  %v1271_v11 = vld [vmem:[#allocation9 + $0x48] sm:$0xff] }
  0x7a   : > { %v445_v19 = vsel %vm2357_vm0, %v433_v14, 0.0  ;;  %v447_v20 = vsel %vm2357_vm0, %v435_v15, 0.0  ;;  %v441_v21 = vsel %vm2357_vm0, %v429_v16, 0.0  ;;  %v443_v22 = vsel %vm2357_vm0, %v431_v18, 0.0  ;;  %vm2383_vm3 = vmpackc.low %vm2357_vm0, %vm2357_vm0  ;;  %v1041_v40 = vld [vmem:[#allocation9 + $0x30] sm:$0xff] }
  0x7b   : > { %v1911_v24 = vpack.i.bf16 %v447_v20, %v445_v19  ;;  %v1901_v25 = vpack.i.bf16 %v443_v22, %v441_v21  ;;  %v422_v28 = vstv %s421_s24  ;;  %s1696_s24 = sshll.u32 %s2333_s28, 1 }
  0x7c   : > { %vm424_vm2 = vcmp.lt.s32.totalorder %v407_v12, %v422_v28  ;;  %s403_s19 = scalar_lea.vmem [#allocation11], %s1696_s24 }
  0x7d   : > { %1912 = vrot.lane.b32.xlu1 %v1911_v24, %s2139_s27  ;;  %1902 = vrot.lane.b32.xlu0 %v1901_v25, %s2139_s27  ;;  %vm2389_vm4 = vmor %vm2370_vm1, %vm424_vm2  ;;  %s1597_s23 = sshll.u32 %s403_s19, 4  ;;  %s2723_s23 = int_to_ptr.vmem [resolvable:$true] %s1597_s23 }
  0x7e   : > { %v446_v36 = vsel %vm2389_vm4, %v434_v29, 0.0  ;;  %v448_v37 = vsel %vm2389_vm4, %v436_v30, 0.0  ;;  %v442_v38 = vsel %vm2389_vm4, %v430_v26, 0.0  ;;  %v444_v39 = vsel %vm2389_vm4, %v432_v27, 0.0  ;;  %vm2404_vm5 = vmpackc.low %vm2389_vm4, %vm2389_vm4  ;;  %s2059_s16 = scalar_lea.vmem %s2723_s23, 32 }
  0x7f   : > { %v1916_v41 = vpack.i.bf16 %v448_v37, %v446_v36  ;;  %v1906_v42 = vpack.i.bf16 %v444_v39, %v442_v38  ;;  %1747 = vmatprep.subr.msk.bf16.mxu0 %vm2404_vm5, %v1745_v31  ;;  %p2060_p3 = scmp.ne.s32.totalorder %s2723_s23, %s2059_s16 }
  0x80   : > { %1750 = vmatpush1.bf16.msk.msra.mxu0 %vm2383_vm3, %v1748_v32 }
  0x81   : > { %1917 = vrot.lane.b32.xlu1 %v1916_v41, %s2139_s27  ;;  %1907 = vrot.lane.b32.xlu0 %v1906_v42, %s2139_s27  ;;  %p2061_p9 = pnand %p2060_p3, %p2806_p8 }
  0x82   : > { %1753 = vmatprep.subr.msk.bf16.mxu0 %vm2404_vm5, %v1751_v35 }
  0x83   : > { %p2062_p12 = pneg %p2061_p9 }
  0x84   : > { %1756 = vmatpush1.bf16.msk.msra.mxu0 %vm2383_vm3, %v1754_v43 }
  0x85   : > { %1932 = vrot.lane.b32.xlu1 %v1906_v42, %s2140_s30  ;;  %1922 = vrot.lane.b32.xlu0 %v1901_v25, %s2140_s30 }
  0x87   : > { %1706 = vmatmul.mubr.msk.f32.vlgmr.msra.gmra.mrb[0].mxu0 %vm483_vm6, %v479_v44 }
  0x88   : > { %566 = vmatprep.mubr.f32.mxu0 %v2138_v10 }
  0x89   : > { %1937 = vrot.lane.b32.xlu1 %v1916_v41, %s2140_s30  ;;  %1927 = vrot.lane.b32.xlu0 %v1911_v24, %s2140_s30 }
  0x8b   : > { %1707 = vmatmul.mubr.msk.f32.gmra.mrb[2].mxu0 %vm483_vm6, %v480_v45 }
  0x8c   : > { %572 = vmatprep.mubr.f32.mxu0 %v2138_v10 }
  0x8d   : > { %836 = vperm.xlu1 %1942, %v826_v48   ;;  %831 = vperm.xlu0 %1941, %v825_v49  }
  0x8f   : > { %1708 = vmatmul.mubr.msk.f32.gmra.mrb[4].mxu0 %vm483_vm6, %v481_v46  ;;  %v474_v46 = vld [vmem:[#allocation6] sm:$0xff] }
  0x90   : > { %578 = vmatprep.mubr.f32.mxu0 %v2138_v10 }
  0x91   : > { %841 = vperm.xlu1 %1942, %v827_v51   ;;  %846 = vperm.xlu0 %1941, %v828_v52   ;;  %v475_v52 = vld [vmem:[#allocation6 + $0x8] sm:$0xff] }
  0x93   : > { %1709 = vmatmul.mubr.msk.f32.gmra.mrb[6].mxu0 %vm483_vm6, %v482_v47 }
  0x94   : > { %661 = vmatprep.mubr.f32.mxu0 %v2138_v10 }
  0x95   : > { %944 = vperm.xlu1 %1942, %v938_v53   ;;  %949 = vperm.xlu0 %1941, %v939_v54   ;;  %v476_v54 = vld [vmem:[#allocation6 + $0x10] sm:$0xff] }
  0x99   : > { %976 = vperm.xlu1 %1942, %v970_v55   ;;  %981 = vperm.xlu0 %1941, %v971_v56   ;;  %v477_v55 = vld [vmem:[#allocation6 + $0x18] sm:$0xff]  ;;  %v712_v56 = vld [vmem:[#allocation6 + $0x40] sm:$0xff] }
  0x9d   : > { %954 = vperm.xlu1 %1942, %v940_v57   ;;  %959 = vperm.xlu0 %1941, %v941_v58   ;;  %v713_v57 = vld [vmem:[#allocation6 + $0x48] sm:$0xff]  ;;  %v714_v58 = vld [vmem:[#allocation6 + $0x50] sm:$0xff] }
  0xa1   : > { %986 = vperm.xlu1 %1942, %v972_v59   ;;  %991 = vperm.xlu0 %1941, %v973_v60   ;;  %v715_v59 = vld [vmem:[#allocation6 + $0x58] sm:$0xff] }
  0xef   : > { %v1913_v61 = vpop.permute.xlu1 %1912  ;;  %v1903_v62 = vpop.permute.xlu0 %1902 }
  0xf0   : > { %v1915_v63 = vunpack.i.h.bf16 %v1913_v61  ;;  %v1914_v0 = vunpack.i.l.bf16 %v1913_v61  ;;  %v1905_v1 = vunpack.i.h.bf16 %v1903_v62  ;;  %v1904_v2 = vunpack.i.l.bf16 %v1903_v62 }
  0xf3   : > { %v1918_v3 = vpop.permute.xlu1 %1917  ;;  %v1908_v4 = vpop.permute.xlu0 %1907 }
  0xf4   : > { %v1920_v5 = vunpack.i.h.bf16 %v1918_v3  ;;  %v1919_v6 = vunpack.i.l.bf16 %v1918_v3  ;;  %v1910_v7 = vunpack.i.h.bf16 %v1908_v4  ;;  %v1909_v8 = vunpack.i.l.bf16 %v1908_v4 }
  0xf6   : > { %v470_v12 = vsel %vm465_vm7, %v1909_v8, %v1904_v2  ;;  %v471_v13 = vsel %vm465_vm7, %v1910_v7, %v1905_v1  ;;  %v466_v15 = vsel %vm465_vm7, %v1904_v2, %v1909_v8  ;;  %v467_v16 = vsel %vm465_vm7, %v1905_v1, %v1910_v7 }
  0xf7   : > { %v1759_v14 = vpack.c.bf16 %v471_v13, %v470_v12  ;;  %v1933_v18 = vpop.permute.xlu1 %1932  ;;  %v1923_v19 = vpop.permute.xlu0 %1922  ;;  %v1757_v20 = vpack.c.bf16 %v467_v16, %v466_v15  ;;  %v468_v21 = vsel %vm465_vm7, %v1914_v0, %v1919_v6  ;;  %v469_v22 = vsel %vm465_vm7, %v1915_v63, %v1920_v5 }
  0xf8   : > { %v1935_v23 = vunpack.i.h.bf16 %v1933_v18  ;;  %v1934_v24 = vunpack.i.l.bf16 %v1933_v18  ;;  %v1925_v25 = vunpack.i.h.bf16 %v1923_v19  ;;  %v1924_v26 = vunpack.i.l.bf16 %v1923_v19 }
  0xf9   : > { %v472_v27 = vsel %vm465_vm7, %v1919_v6, %v1914_v0  ;;  %v473_v28 = vsel %vm465_vm7, %v1920_v5, %v1915_v63  ;;  %1758 = vmatprep.subr.bf16.mxu0 %v1757_v20  ;;  %v1761_v29 = vpack.c.bf16 %v469_v22, %v468_v21 }
  0xfa   : > { %1760 = vmatpush1.bf16.msra.mxu0 %v1759_v14  ;;  %v704_v30 = vsel %vm702_vm8, %v1925_v25, %v1935_v23  ;;  %v707_v35 = vsel %vm702_vm8, %v1934_v24, %v1924_v26  ;;  %v708_v36 = vsel %vm702_vm8, %v1935_v23, %v1925_v25  ;;  %v703_v37 = vsel %vm702_vm8, %v1924_v26, %v1934_v24 }
  0xfb   : > { %v1938_v31 = vpop.permute.xlu1 %1937  ;;  %v1928_v32 = vpop.permute.xlu0 %1927  ;;  %1762 = vmatprep.subr.bf16.mxu0 %v1761_v29  ;;  %v1763_v42 = vpack.c.bf16 %v473_v28, %v472_v27  ;;  %v1765_v44 = vpack.c.bf16 %v708_v36, %v707_v35  ;;  %v1767_v47 = vpack.c.bf16 %v704_v30, %v703_v37 }
  0xfc   : > { %v1940_v38 = vunpack.i.h.bf16 %v1938_v31  ;;  %v1939_v39 = vunpack.i.l.bf16 %v1938_v31  ;;  %v1930_v41 = vunpack.i.h.bf16 %v1928_v32  ;;  %v1929_v43 = vunpack.i.l.bf16 %v1928_v32 }
  0xfe   : > { %v710_v45 = vsel %vm702_vm8, %v1940_v38, %v1930_v41  ;;  %1764 = vmatpush1.bf16.msra.mxu0 %v1763_v42  ;;  %v709_v48 = vsel %vm702_vm8, %v1939_v39, %v1929_v43  ;;  %v706_v49 = vsel %vm702_vm8, %v1930_v41, %v1940_v38  ;;  %v705_v50 = vsel %vm702_vm8, %v1929_v43, %v1939_v39 }
  0xff   : > { %1766 = vmatprep.subr.bf16.mxu0 %v1765_v44  ;;  %v1769_v51 = vpack.c.bf16 %v710_v45, %v709_v48  ;;  %v1771_v53 = vpack.c.bf16 %v706_v49, %v705_v50 }
 0x101   : > { %1710 = vmatmul.mubr.msk.f32.vlgmr.msra.gmra.mrb[0].mxu0 %vm483_vm6, %v474_v46 }
 0x102   : > { %667 = vmatprep.mubr.f32.mxu0 %v2138_v10  ;;  %1768 = vmatpush1.bf16.msra.mxu0 %v1767_v47 }
 0x103   : > { %1770 = vmatprep.subr.bf16.mxu0 %v1769_v51 }
 0x105   : > { %1711 = vmatmul.mubr.msk.f32.gmra.mrb[2].mxu0 %vm483_vm6, %v475_v52 }
 0x106   : > { %673 = vmatprep.mubr.f32.mxu0 %v2138_v10  ;;  %1772 = vmatpush1.bf16.msra.mxu0 %v1771_v53 }
 0x109   : > { %1712 = vmatmul.mubr.msk.f32.gmra.mrb[4].mxu0 %vm483_vm6, %v476_v54 }
 0x10a   : > { %679 = vmatprep.mubr.f32.mxu0 %v2138_v10 }
 0x10c   : > { %v832_v60 = vpop.permute.xlu0 %831  ;;  %v837_v0 = vpop.permute.xlu1 %836 }
 0x10d   : > { %1713 = vmatmul.mubr.msk.f32.gmra.mrb[6].mxu0 %vm483_vm6, %v477_v55 }
 0x10e   : > { %792 = vmatprep.mubr.f32.mxu0 %v2138_v10 }
 0x110   : > { %v842_v12 = vpop.permute.xlu1 %841  ;;  %v847_v27 = vpop.permute.xlu0 %846 }
 0x111   : > { %1714 = vmatmul.mubr.msk.f32.vlgmr.msra.gmra.mrb[0].mxu0 %vm483_vm6, %v712_v56 }
 0x112   : > { %798 = vmatprep.mubr.f32.mxu0 %v2138_v10 }
 0x115   : > { %1715 = vmatmul.mubr.msk.f32.gmra.mrb[2].mxu0 %vm483_vm6, %v713_v57 }
 0x116   : > { %804 = vmatprep.mubr.f32.mxu0 %v2138_v10 }
 0x119   : > { %1716 = vmatmul.mubr.msk.f32.gmra.mrb[4].mxu0 %vm483_vm6, %v714_v58 }
 0x11a   : > { %810 = vmatprep.mubr.f32.mxu0 %v2138_v10 }
 0x11d   : > { %1717 = vmatmul.mubr.msk.f32.gmra.mrb[6].mxu0 %vm483_vm6, %v715_v59 }
 0x1e4   : > { %v794_v61 = vpop.f32.mrb[0].mxu0 }
 0x1e5   : > { %v849_v62 = vadd.f32 %v832_v60, %v794_v61  ;;  %v796_v63 = vpop.f32.mrb[1].mxu0 }
 0x1e6   : > { %v850_v1 = vadd.f32 %v832_v60, %v796_v63 }
 0x1e7   : > { %v2515_v3 = vmax.f32 %v849_v62, 0.0 }
 0x1e8   : > { %v800_v2 = vpop.f32.mrb[2].mxu0  ;;  %v2517_v6 = vmax.f32 %v850_v1, 0.0 }
 0x1e9   : > { %v851_v4 = vadd.f32 %v837_v0, %v800_v2  ;;  %v802_v5 = vpop.f32.mrb[3].mxu0  ;;  %v886_v15 = vmul.f32 %v2515_v3, %v2515_v3 }
 0x1ea   : > { %v852_v7 = vadd.f32 %v837_v0, %v802_v5  ;;  %v887_v21 = vmul.f32 %v2517_v6, %v2517_v6 }
 0x1eb   : > { %v2519_v8 = vmax.f32 %v851_v4, 0.0 }
 0x1ec   : > { %v2521_v13 = vmax.f32 %v852_v7, 0.0  ;;  %v806_v14 = vpop.f32.mrb[4].mxu0 }
 0x1ed   : > { %v865_v16 = vadd.f32 %v2519_v8, %v2515_v3  ;;  %v888_v18 = vmul.f32 %v2519_v8, %v2519_v8  ;;  %v853_v19 = vadd.f32 %v842_v12, %v806_v14  ;;  %v808_v20 = vpop.f32.mrb[5].mxu0 }
 0x1ee   : > { %v874_v22 = vadd.f32 %v2521_v13, %v2517_v6  ;;  %v889_v23 = vmul.f32 %v2521_v13, %v2521_v13  ;;  %v854_v24 = vadd.f32 %v842_v12, %v808_v20 }
 0x1ef   : > { %v894_v25 = vadd.f32 %v888_v18, %v886_v15  ;;  %v2535_v26 = vmax.f32 %v853_v19, 0.0 }
 0x1f0   : > { %v903_v28 = vadd.f32 %v889_v23, %v887_v21  ;;  %v2537_v29 = vmax.f32 %v854_v24, 0.0  ;;  %v812_v30 = vpop.f32.mrb[6].mxu0 }
 0x1f1   : > { %v866_v31 = vadd.f32 %v865_v16, %v2535_v26  ;;  %v890_v32 = vmul.f32 %v2535_v26, %v2535_v26  ;;  %v855_v35 = vadd.f32 %v847_v27, %v812_v30  ;;  %v814_v36 = vpop.f32.mrb[7].mxu0 }
 0x1f2   : > { %v875_v37 = vadd.f32 %v874_v22, %v2537_v29  ;;  %v891_v38 = vmul.f32 %v2537_v29, %v2537_v29  ;;  %v856_v39 = vadd.f32 %v847_v27, %v814_v36 }
 0x1f3   : > { %v895_v41 = vadd.f32 %v894_v25, %v890_v32  ;;  %v863_v42 = vmax.f32 %v855_v35, 0.0  ;;  %v950_v32 = vpop.permute.xlu0 %949 }
 0x1f4   : > { %v904_v43 = vadd.f32 %v903_v28, %v891_v38  ;;  %v2545_v44 = vmax.f32 %v856_v39, 0.0 }
 0x1f5   : > { %v867_v45 = vadd.f32 %v866_v31, %v863_v42  ;;  %v892_v46 = vmul.f32 %v863_v42, %v863_v42  ;;  %v945_v31 = vpop.permute.xlu1 %944 }
 0x1f6   : > { %v876_v47 = vadd.f32 %v875_v37, %v2545_v44  ;;  %v893_v48 = vmul.f32 %v2545_v44, %v2545_v44 }
 0x1f7   : > { %v868_v49 = vrot.slane %v867_v45, 4  ;;  %v896_v50 = vadd.f32 %v895_v41, %v892_v46 }
 0x1f8   : > { %v877_v51 = vrot.slane %v876_v47, 4  ;;  %v905_v52 = vadd.f32 %v904_v43, %v893_v48 }
 0x1f9   : > { %v869_v53 = vadd.f32 %v868_v49, %v867_v45  ;;  %v897_v54 = vrot.slane %v896_v50, 4  ;;  %v977_v43 = vpop.permute.xlu1 %976 }
 0x1fa   : > { %v878_v55 = vadd.f32 %v877_v51, %v876_v47  ;;  %v906_v56 = vrot.slane %v905_v52, 4 }
 0x1fb   : > { %v870_v57 = vrot.slane %v869_v53, 2  ;;  %v898_v58 = vadd.f32 %v897_v54, %v896_v50 }
 0x1fc   : > { %v879_v59 = vrot.slane %v878_v55, 2  ;;  %v907_v60 = vadd.f32 %v906_v56, %v905_v52 }
 0x1fd   : > { %v871_v61 = vadd.f32 %v870_v57, %v869_v53  ;;  %v899_v62 = vrot.slane %v898_v58, 2  ;;  %v955_v45 = vpop.permute.xlu1 %954 }
 0x1fe   : > { %v880_v63 = vadd.f32 %v879_v59, %v878_v55  ;;  %v908_v0 = vrot.slane %v907_v60, 2 }
 0x1ff   : > { %v872_v1 = vrot.slane %v871_v61, 1  ;;  %v900_v2 = vadd.f32 %v899_v62, %v898_v58 }
 0x200   : > { %v881_v4 = vrot.slane %v880_v63, 1  ;;  %v909_v5 = vadd.f32 %v908_v0, %v907_v60 }
 0x201   : > { %v873_v7 = vadd.f32 %v872_v1, %v871_v61  ;;  %v901_v12 = vrot.slane %v900_v2, 1  ;;  %v987_v56 = vpop.permute.xlu1 %986 }
 0x202   : > { %v882_v14 = vadd.f32 %v881_v4, %v880_v63  ;;  %v910_v15 = vrot.slane %v909_v5, 1 }
 0x203   : > { %v884_v16 = vmul.f32 0.03125, %v873_v7  ;;  %v902_v18 = vadd.f32 %v901_v12, %v900_v2 }
 0x204   : > { %v885_v19 = vmul.f32 0.03125, %v882_v14  ;;  %v911_v20 = vadd.f32 %v910_v15, %v909_v5 }
 0x205   : > { %v912_v21 = vmul.f32 0.03125, %v902_v18  ;;  %v914_v22 = vmul.f32 %v884_v16, %v884_v16  ;;  %v924_v23 = vsub.f32 %v863_v42, %v884_v16  ;;  %v918_v24 = vsub.f32 %v2515_v3, %v884_v16 }
 0x206   : > { %v913_v25 = vmul.f32 0.03125, %v911_v20  ;;  %v915_v27 = vmul.f32 %v885_v19, %v885_v19  ;;  %v925_v28 = vsub.f32 %v2545_v44, %v885_v19  ;;  %v920_v30 = vsub.f32 %v2519_v8, %v884_v16  ;;  %v982_v44 = vpop.permute.xlu0 %981 }
 0x207   : > { %v916_v35 = vsub.f32 %v912_v21, %v914_v22  ;;  %v919_v36 = vsub.f32 %v2517_v6, %v885_v19  ;;  %v921_v37 = vsub.f32 %v2521_v13, %v885_v19  ;;  %v923_v38 = vsub.f32 %v2537_v29, %v885_v19 }
 0x208   : > { %v917_v39 = vsub.f32 %v913_v25, %v915_v27  ;;  %v922_v41 = vsub.f32 %v2535_v26, %v884_v16 }
 0x209   : > { %v926_v42 = vadd.f32 0.0001, %v916_v35  ;;  %v1040_v35 = vld [vmem:[#allocation9 + $0x28] sm:$0xff] }
 0x20a   : > { %v927_v3 = vadd.f32 0.0001, %v917_v39  ;;  %v960_v8 = vpop.permute.xlu0 %959  ;;  %v1386_v39 = vld [vmem:[%s2772_s7 + $0x18] sm:$0xff] }
 0x20b   : > { %1983 = vrsqrt.f32 %v926_v42  ;;  %v1496_v42 = vld [vmem:[%s2773_s8 + $0x8] sm:$0xff] }
 0x20c   : > { %1985 = vrsqrt.f32 %v927_v3  ;;  %v1497_v3 = vld [vmem:[%s2773_s8 + $0x10] sm:$0xff] }
 0x20e   : > { %v992_v57 = vpop.permute.xlu0 %991 }
 0x215   : > { %v1984_v46 = vpop.eup %1983 }
 0x216   : > { %v1986_v47 = vpop.eup %1985  ;;  %v936_v48 = vmul.f32 %v1984_v46, %v924_v23  ;;  %v930_v49 = vmul.f32 %v1984_v46, %v918_v24  ;;  %v932_v6 = vmul.f32 %v1984_v46, %v920_v30  ;;  %v934_v50 = vmul.f32 %v1984_v46, %v922_v41  ;;  %v1495_v41 = vld [vmem:[%s2773_s8] sm:$0xff] }
 0x217   : > { %v937_v13 = vmul.f32 %v1986_v47, %v925_v28  ;;  %v931_v51 = vmul.f32 %v1986_v47, %v919_v36  ;;  %v933_v29 = vmul.f32 %v1986_v47, %v921_v37  ;;  %v935_v52 = vmul.f32 %v1986_v47, %v923_v38  ;;  %v1384_v36 = vld [vmem:[%s2772_s7 + $0x8] sm:$0xff]  ;;  %v1385_v37 = vld [vmem:[%s2772_s7 + $0x10] sm:$0xff]  ;;  %v1042_v38 = vld [vmem:[#allocation9 + $0x38] sm:$0xff] }
 0x218   : > { %v962_v53 = vmul.f32 %v945_v31, %v930_v49  ;;  %v964_v26 = vmul.f32 %v950_v32, %v932_v6  ;;  %v966_v54 = vmul.f32 %v955_v45, %v934_v50  ;;  %v968_v55 = vmul.f32 %v960_v8, %v936_v48 }
 0x219   : > { %v969_v58 = vmul.f32 %v960_v8, %v937_v13  ;;  %v963_v59 = vmul.f32 %v945_v31, %v931_v51  ;;  %v965_v60 = vmul.f32 %v950_v32, %v933_v29  ;;  %v967_v61 = vmul.f32 %v955_v45, %v935_v52  ;;  %v1039_v32 = vld [vmem:[#allocation9 + $0x20] sm:$0xff] }
 0x21a   : > { %v994_v62 = vadd.f32 %v977_v43, %v962_v53  ;;  %v996_v63 = vadd.f32 %v982_v44, %v964_v26  ;;  %v998_v0 = vadd.f32 %v987_v56, %v966_v54  ;;  %v1000_v1 = vadd.f32 %v992_v57, %v968_v55 }
 0x21b   : > { %v995_v2 = vadd.f32 %v977_v43, %v963_v59  ;;  %v997_v4 = vadd.f32 %v982_v44, %v965_v60  ;;  %v999_v5 = vadd.f32 %v987_v56, %v967_v61  ;;  %v1001_v7 = vadd.f32 %v992_v57, %v969_v58  ;;  %v1498_v43 = vld [vmem:[%s2773_s8 + $0x18] sm:$0xff]  ;;  %v1545_v44 = vld [vmem:[#allocation4] sm:$0x1] }
 0x21c   : > { %v1002_v12 = vsel %vm2357_vm0, %v994_v62, 0.0  ;;  %v1004_v14 = vsel %vm2357_vm0, %v996_v63, 0.0  ;;  %v1776_v15 = vpack.c.bf16 %v996_v63, %v994_v62  ;;  %v1006_v16 = vsel %vm2357_vm0, %v998_v0, 0.0 }
 0x21d   : > { %v1943_v18 = vpack.i.bf16 %v1004_v14, %v1002_v12  ;;  %v1773_v19 = vpack.c.bf16 %v997_v4, %v995_v2  ;;  %v1003_v20 = vsel %vm2389_vm4, %v995_v2, 0.0  ;;  %v1005_v21 = vsel %vm2389_vm4, %v997_v4, 0.0 }
 0x21e   : > { %v1953_v22 = vpack.i.bf16 %v1005_v21, %v1003_v20  ;;  %v1779_v23 = vpack.c.bf16 %v1001_v7, %v999_v5  ;;  %v1008_v24 = vsel %vm2357_vm0, %v1000_v1, 0.0  ;;  %v1782_v25 = vpack.c.bf16 %v1000_v1, %v998_v0 }
 0x21f   : > { %1944 = vrot.lane.b32.xlu1 %v1943_v18, %s2139_s27  ;;  %1775 = vmatprep.subr.msk.bf16.mxu1 %vm2404_vm5, %v1773_v19  ;;  %v1948_v27 = vpack.i.bf16 %v1008_v24, %v1006_v16  ;;  %v1007_v28 = vsel %vm2389_vm4, %v999_v5, 0.0  ;;  %v1009_v30 = vsel %vm2389_vm4, %v1001_v7, 0.0  ;;  %v1034_v16 = vld [vmem:[#allocation9] sm:$0xff] }
 0x220   : > { %1778 = vmatpush1.bf16.msk.msra.mxu1 %vm2383_vm3, %v1776_v15  ;;  %1954 = vrot.lane.b32.xlu0 %v1953_v22, %s2139_s27  ;;  %v1958_v31 = vpack.i.bf16 %v1009_v30, %v1007_v28 }
 0x221   : > { %1781 = vmatprep.subr.msk.bf16.mxu1 %vm2404_vm5, %v1779_v23 }
 0x223   : > { %1949 = vrot.lane.b32.xlu1 %v1948_v27, %s2139_s27 }
 0x224   : > { %1784 = vmatpush1.bf16.msk.msra.mxu1 %vm2383_vm3, %v1782_v25  ;;  %1959 = vrot.lane.b32.xlu0 %v1958_v31, %s2139_s27  ;;  %s1744_s27 = sshll.u32 %s2226_s22, 5  ;;  %s2143_s22 = smov [#allocation11]  }
 0x225   : > { %s2721_s14 = scalar_lea.hbm %s2774_s10, %s1744_s27  ;;  %s2063_s17 = sshll.u32 %s2143_s22, 4  ;;  %s2064_s17 = int_to_ptr.vmem [resolvable:$false] %s2063_s17 }
 0x226   : > { %s2065_s18 = scalar_lea.vmem %s2064_s17, 64  ;;  %p2066_p13 = scmp.lt.s32.totalorder %s2723_s23, %s2064_s17 }
 0x227   : > { %1964 = vrot.lane.b32.xlu1 %v1943_v18, %s2140_s30  ;;  %1726 = vmatmul.mubr.msk.f32.vlgmr.msra.gmra.mrb[0].mxu1 %vm483_vm6, %v1039_v32  ;;  %p2067_p0 = scmp.lt.s32.totalorder %s2065_s18, %s2059_s16 }
 0x228   : > { %1974 = vrot.lane.b32.xlu0 %v1953_v22, %s2140_s30  ;;  %1125 = vmatprep.mubr.f32.mxu1 %v2138_v10 }
 0x229   : > { %p2068_p4 = por %p2067_p0, %p2066_p13 }
 0x22b   : > { %1969 = vrot.lane.b32.xlu1 %v1948_v27, %s2140_s30  ;;  %1727 = vmatmul.mubr.msk.f32.gmra.mrb[2].mxu1 %vm483_vm6, %v1040_v35  ;;  %p2069_p7 = pnand %p2068_p4, %p2062_p12 }
 0x22c   : > { %1979 = vrot.lane.b32.xlu0 %v1958_v31, %s2140_s30  ;;  %1131 = vmatprep.mubr.f32.mxu1 %v2138_v10  ;;  %v1035_v31 = vld [vmem:[#allocation9 + $0x8] sm:$0xff] }
 0x22f   : > { %1389 = vperm.xlu1 %1942, %v1383_v33   ;;  %1728 = vmatmul.mubr.msk.f32.gmra.mrb[4].mxu1 %vm483_vm6, %v1041_v40 }
 0x230   : > { %1394 = vperm.xlu0 %1941, %v1384_v36   ;;  %1137 = vmatprep.mubr.f32.mxu1 %v2138_v10  ;;  %v1036_v36 = vld [vmem:[#allocation9 + $0x10] sm:$0xff] }
 0x233   : > { %1399 = vperm.xlu1 %1942, %v1385_v37   ;;  %1729 = vmatmul.mubr.msk.f32.gmra.mrb[6].mxu1 %vm483_vm6, %v1042_v38  ;;  %v1037_v37 = vld [vmem:[#allocation9 + $0x18] sm:$0xff]  ;;  %v1270_v38 = vld [vmem:[#allocation9 + $0x40] sm:$0xff] }
 0x234   : > { %1404 = vperm.xlu0 %1941, %v1386_v39   ;;  %1220 = vmatprep.mubr.f32.mxu1 %v2138_v10  ;;  %v1272_v39 = vld [vmem:[#allocation9 + $0x50] sm:$0xff] }
 0x237   : > { %1501 = vperm.xlu1 %1942, %v1495_v41   ;;  %v1273_v41 = vld [vmem:[#allocation9 + $0x58] sm:$0xff] }
 0x238   : > { %1506 = vperm.xlu0 %1941, %v1496_v42  }
 0x23b   : > { %1511 = vperm.xlu1 %1942, %v1497_v3  }
 0x23c   : > { %1516 = vperm.xlu0 %1941, %v1498_v43  }
 0x23f   : > { %1548 = vperm.xlu1 %1942, %v1545_v44  }
 0x291   : > { %v1945_v45 = vpop.permute.xlu1 %1944 }
 0x292   : > { %v1947_v8 = vunpack.i.h.bf16 %v1945_v45  ;;  %v1946_v46 = vunpack.i.l.bf16 %v1945_v45  ;;  %v1955_v47 = vpop.permute.xlu0 %1954 }
 0x293   : > { %v1957_v48 = vunpack.i.h.bf16 %v1955_v47  ;;  %v1956_v49 = vunpack.i.l.bf16 %v1955_v47 }
 0x295   : > { %v1031_v6 = vsel %vm465_vm7, %v1957_v48, %v1947_v8  ;;  %v1030_v50 = vsel %vm465_vm7, %v1956_v49, %v1946_v46  ;;  %v1950_v13 = vpop.permute.xlu1 %1949  ;;  %v1026_v51 = vsel %vm465_vm7, %v1946_v46, %v1956_v49  ;;  %v1027_v29 = vsel %vm465_vm7, %v1947_v8, %v1957_v48 }
 0x296   : > { %v1787_v52 = vpack.c.bf16 %v1031_v6, %v1030_v50  ;;  %v1952_v53 = vunpack.i.h.bf16 %v1950_v13  ;;  %v1951_v26 = vunpack.i.l.bf16 %v1950_v13  ;;  %v1960_v54 = vpop.permute.xlu0 %1959  ;;  %v1785_v55 = vpack.c.bf16 %v1027_v29, %v1026_v51 }
 0x297   : > { %v1962_v56 = vunpack.i.h.bf16 %v1960_v54  ;;  %v1961_v57 = vunpack.i.l.bf16 %v1960_v54 }
 0x298   : > { %1786 = vmatprep.subr.bf16.mxu1 %v1785_v55 }
 0x299   : > { %v1033_v58 = vsel %vm465_vm7, %v1962_v56, %v1952_v53  ;;  %v1032_v59 = vsel %vm465_vm7, %v1961_v57, %v1951_v26  ;;  %v1965_v60 = vpop.permute.xlu1 %1964  ;;  %1788 = vmatpush1.bf16.msra.mxu1 %v1787_v52  ;;  %v1028_v61 = vsel %vm465_vm7, %v1951_v26, %v1961_v57  ;;  %v1029_v62 = vsel %vm465_vm7, %v1952_v53, %v1962_v56 }
 0x29a   : > { %v1791_v63 = vpack.c.bf16 %v1033_v58, %v1032_v59  ;;  %v1967_v0 = vunpack.i.h.bf16 %v1965_v60  ;;  %v1966_v1 = vunpack.i.l.bf16 %v1965_v60  ;;  %v1975_v2 = vpop.permute.xlu0 %1974  ;;  %v1789_v4 = vpack.c.bf16 %v1029_v62, %v1028_v61 }
 0x29b   : > { %v1977_v5 = vunpack.i.h.bf16 %v1975_v2  ;;  %v1976_v7 = vunpack.i.l.bf16 %v1975_v2 }
 0x29c   : > { %1790 = vmatprep.subr.bf16.mxu1 %v1789_v4 }
 0x29d   : > { %v1262_v12 = vsel %vm702_vm8, %v1967_v0, %v1977_v5  ;;  %v1261_v14 = vsel %vm702_vm8, %v1966_v1, %v1976_v7  ;;  %v1970_v15 = vpop.permute.xlu1 %1969  ;;  %1792 = vmatpush1.bf16.msra.mxu1 %v1791_v63  ;;  %v1265_v18 = vsel %vm702_vm8, %v1976_v7, %v1966_v1  ;;  %v1266_v19 = vsel %vm702_vm8, %v1977_v5, %v1967_v0 }
 0x29e   : > { %v1795_v20 = vpack.c.bf16 %v1262_v12, %v1261_v14  ;;  %v1972_v21 = vunpack.i.h.bf16 %v1970_v15  ;;  %v1971_v22 = vunpack.i.l.bf16 %v1970_v15  ;;  %v1980_v23 = vpop.permute.xlu0 %1979  ;;  %v1793_v24 = vpack.c.bf16 %v1266_v19, %v1265_v18 }
 0x29f   : > { %v1982_v25 = vunpack.i.h.bf16 %v1980_v23  ;;  %v1981_v27 = vunpack.i.l.bf16 %v1980_v23 }
 0x2a0   : > { %1730 = vmatmul.mubr.msk.f32.vlgmr.msra.gmra.mrb[0].mxu1 %vm483_vm6, %v1034_v16  ;;  %1794 = vmatprep.subr.bf16.mxu1 %v1793_v24 }
 0x2a1   : > { %v1264_v28 = vsel %vm702_vm8, %v1972_v21, %v1982_v25  ;;  %v1263_v30 = vsel %vm702_vm8, %v1971_v22, %v1981_v27  ;;  %1796 = vmatpush1.bf16.msra.mxu1 %v1795_v20  ;;  %1226 = vmatprep.mubr.f32.mxu1 %v2138_v10  ;;  %v1267_v32 = vsel %vm702_vm8, %v1981_v27, %v1971_v22 }
 0x2a2   : > { %v1799_v35 = vpack.c.bf16 %v1264_v28, %v1263_v30  ;;  %v1268_v33 = vsel %vm702_vm8, %v1982_v25, %v1972_v21 }
 0x2a3   : > { %v1797_v40 = vpack.c.bf16 %v1268_v33, %v1267_v32 }
 0x2a4   : > { %1731 = vmatmul.mubr.msk.f32.gmra.mrb[2].mxu1 %vm483_vm6, %v1035_v31 }
 0x2a5   : > { %1798 = vmatprep.subr.bf16.mxu1 %v1797_v40  ;;  %1232 = vmatprep.mubr.f32.mxu1 %v2138_v10 }
 0x2a6   : > { %1800 = vmatpush1.bf16.msra.mxu1 %v1799_v35 }
 0x2a8   : > { %1732 = vmatmul.mubr.msk.f32.gmra.mrb[4].mxu1 %vm483_vm6, %v1036_v36 }
 0x2a9   : > { %1238 = vmatprep.mubr.f32.mxu1 %v2138_v10 }
 0x2ac   : > { %1733 = vmatmul.mubr.msk.f32.gmra.mrb[6].mxu1 %vm483_vm6, %v1037_v37 }
 0x2ad   : > { %1350 = vmatprep.mubr.f32.mxu1 %v2138_v10 }
 0x2ae   : > { %v1390_v42 = vpop.permute.xlu1 %1389 }
 0x2af   : > { %v1395_v8 = vpop.permute.xlu0 %1394 }
 0x2b0   : > { %1734 = vmatmul.mubr.msk.f32.vlgmr.msra.gmra.mrb[0].mxu1 %vm483_vm6, %v1270_v38 }
 0x2b1   : > { %1356 = vmatprep.mubr.f32.mxu1 %v2138_v10 }
 0x2b3   : > { %v1405_v62 = vpop.permute.xlu0 %1404 }
 0x2b4   : > { %1735 = vmatmul.mubr.msk.f32.gmra.mrb[2].mxu1 %vm483_vm6, %v1271_v11 }
 0x2b5   : > { %1362 = vmatprep.mubr.f32.mxu1 %v2138_v10 }
 0x2b8   : > { %1736 = vmatmul.mubr.msk.f32.gmra.mrb[4].mxu1 %vm483_vm6, %v1272_v39 }
 0x2b9   : > { %1368 = vmatprep.mubr.f32.mxu1 %v2138_v10  ;;  %v1400_v10 = vpop.permute.xlu1 %1399 }
 0x2bc   : > { %1737 = vmatmul.mubr.msk.f32.gmra.mrb[6].mxu1 %vm483_vm6, %v1273_v41 }
 0x383   : > { %v1352_v3 = vpop.f32.mrb[0].mxu1 }
 0x384   : > { %v1407_v43 = vadd.f32 %v1390_v42, %v1352_v3  ;;  %v1354_v44 = vpop.f32.mrb[1].mxu1 }
 0x385   : > { %v1408_v45 = vadd.f32 %v1390_v42, %v1354_v44 }
 0x386   : > { %v2668_v47 = vmax.f32 %v1407_v43, 0.0 }
 0x387   : > { %v1358_v46 = vpop.f32.mrb[2].mxu1  ;;  %v2670_v6 = vmax.f32 %v1408_v45, 0.0 }
 0x388   : > { %v1409_v48 = vadd.f32 %v1395_v8, %v1358_v46  ;;  %v1360_v49 = vpop.f32.mrb[3].mxu1  ;;  %v1443_v52 = vmul.f32 %v2668_v47, %v2668_v47 }
 0x389   : > { %v1410_v50 = vadd.f32 %v1395_v8, %v1360_v49  ;;  %v1444_v56 = vmul.f32 %v2670_v6, %v2670_v6 }
 0x38a   : > { %v2672_v13 = vmax.f32 %v1409_v48, 0.0 }
 0x38b   : > { %v2674_v51 = vmax.f32 %v1410_v50, 0.0  ;;  %v1364_v29 = vpop.f32.mrb[4].mxu1 }
 0x38c   : > { %v1423_v53 = vadd.f32 %v2672_v13, %v2668_v47  ;;  %v1445_v26 = vmul.f32 %v2672_v13, %v2672_v13  ;;  %v1411_v54 = vadd.f32 %v1400_v10, %v1364_v29  ;;  %v1366_v55 = vpop.f32.mrb[5].mxu1 }
 0x38d   : > { %v1432_v57 = vadd.f32 %v2674_v51, %v2670_v6  ;;  %v1446_v58 = vmul.f32 %v2674_v51, %v2674_v51  ;;  %v1412_v59 = vadd.f32 %v1400_v10, %v1366_v55 }
 0x38e   : > { %v1451_v60 = vadd.f32 %v1445_v26, %v1443_v52  ;;  %v2688_v61 = vmax.f32 %v1411_v54, 0.0 }
 0x38f   : > { %v1460_v63 = vadd.f32 %v1446_v58, %v1444_v56  ;;  %v2690_v0 = vmax.f32 %v1412_v59, 0.0  ;;  %v1370_v1 = vpop.f32.mrb[6].mxu1 }
 0x390   : > { %v1424_v2 = vadd.f32 %v1423_v53, %v2688_v61  ;;  %v1447_v4 = vmul.f32 %v2688_v61, %v2688_v61  ;;  %v1413_v5 = vadd.f32 %v1405_v62, %v1370_v1  ;;  %v1372_v7 = vpop.f32.mrb[7].mxu1 }
 0x391   : > { %v1433_v12 = vadd.f32 %v1432_v57, %v2690_v0  ;;  %v1448_v14 = vmul.f32 %v2690_v0, %v2690_v0  ;;  %v1414_v15 = vadd.f32 %v1405_v62, %v1372_v7 }
 0x392   : > { %v1452_v16 = vadd.f32 %v1451_v60, %v1447_v4  ;;  %v1421_v18 = vmax.f32 %v1413_v5, 0.0 }
 0x393   : > { %v1461_v19 = vadd.f32 %v1460_v63, %v1448_v14  ;;  %v2698_v20 = vmax.f32 %v1414_v15, 0.0 }
 0x394   : > { %v1425_v21 = vadd.f32 %v1424_v2, %v1421_v18  ;;  %v1449_v22 = vmul.f32 %v1421_v18, %v1421_v18 }
 0x395   : > { %v1434_v23 = vadd.f32 %v1433_v12, %v2698_v20  ;;  %v1450_v24 = vmul.f32 %v2698_v20, %v2698_v20 }
 0x396   : > { %v1426_v25 = vrot.slane %v1425_v21, 4  ;;  %v1453_v27 = vadd.f32 %v1452_v16, %v1449_v22 }
 0x397   : > { %v1435_v28 = vrot.slane %v1434_v23, 4  ;;  %v1462_v30 = vadd.f32 %v1461_v19, %v1450_v24 }
 0x398   : > { %v1427_v31 = vadd.f32 %v1426_v25, %v1425_v21  ;;  %v1454_v32 = vrot.slane %v1453_v27, 4 }
 0x399   : > { %v1436_v35 = vadd.f32 %v1435_v28, %v1434_v23  ;;  %v1463_v33 = vrot.slane %v1462_v30, 4 }
 0x39a   : > { %v1428_v40 = vrot.slane %v1427_v31, 2  ;;  %v1455_v36 = vadd.f32 %v1454_v32, %v1453_v27 }
 0x39b   : > { %v1437_v37 = vrot.slane %v1436_v35, 2  ;;  %v1464_v38 = vadd.f32 %v1463_v33, %v1462_v30 }
 0x39c   : > { %v1429_v11 = vadd.f32 %v1428_v40, %v1427_v31  ;;  %v1456_v39 = vrot.slane %v1455_v36, 2 }
 0x39d   : > { %v1438_v41 = vadd.f32 %v1437_v37, %v1436_v35  ;;  %v1465_v42 = vrot.slane %v1464_v38, 2 }
 0x39e   : > { %v1430_v3 = vrot.slane %v1429_v11, 1  ;;  %v1457_v43 = vadd.f32 %v1456_v39, %v1455_v36  ;;  %v1552_v39 = vshrl.u32 %v405_v9, 7 }
 0x39f   : > { %v1439_v44 = vrot.slane %v1438_v41, 1  ;;  %v1466_v45 = vadd.f32 %v1465_v42, %v1464_v38 }
 0x3a0   : > { %v1431_v8 = vadd.f32 %v1430_v3, %v1429_v11  ;;  %v1458_v46 = vrot.slane %v1457_v43, 1 }
 0x3a1   : > { %v1440_v48 = vadd.f32 %v1439_v44, %v1438_v41  ;;  %v1467_v49 = vrot.slane %v1466_v45, 1  ;;  %v1553_v44 = vsub.s32 0, %v1552_v39 }
 0x3a2   : > { %v1441_v50 = vmul.f32 0.03125, %v1431_v8  ;;  %v1459_v10 = vadd.f32 %v1458_v46, %v1457_v43 }
 0x3a3   : > { %v1442_v29 = vmul.f32 0.03125, %v1440_v48  ;;  %v1468_v52 = vadd.f32 %v1467_v49, %v1466_v45  ;;  %v2142_v45 = vmov 1966171168  }
 0x3a4   : > { %v1469_v53 = vmul.f32 0.03125, %v1459_v10  ;;  %v1471_v26 = vmul.f32 %v1441_v50, %v1441_v50  ;;  %v1475_v54 = vsub.f32 %v2668_v47, %v1441_v50  ;;  %v1477_v55 = vsub.f32 %v2672_v13, %v1441_v50  ;;  %v1502_v47 = vpop.permute.xlu1 %1501 }
 0x3a5   : > { %v1479_v56 = vsub.f32 %v2688_v61, %v1441_v50  ;;  %v1481_v57 = vsub.f32 %v1421_v18, %v1441_v50  ;;  %v1470_v58 = vmul.f32 0.03125, %v1468_v52  ;;  %v1472_v59 = vmul.f32 %v1442_v29, %v1442_v29  ;;  %v1507_v61 = vpop.permute.xlu0 %1506 }
 0x3a6   : > { %v1473_v60 = vsub.f32 %v1469_v53, %v1471_v26  ;;  %v1476_v62 = vsub.f32 %v2670_v6, %v1442_v29  ;;  %v1478_v63 = vsub.f32 %v2674_v51, %v1442_v29  ;;  %v1480_v1 = vsub.f32 %v2690_v0, %v1442_v29 }
 0x3a7   : > { %v1474_v2 = vsub.f32 %v1470_v58, %v1472_v59  ;;  %v1482_v4 = vsub.f32 %v2698_v20, %v1442_v29  ;;  %v1563_v8 = vunpack.c.l.s4 %v2142_v45 }
 0x3a8   : > { %v1483_v5 = vadd.f32 0.0001, %v1473_v60  ;;  %v1512_v23 = vpop.permute.xlu1 %1511 }
 0x3a9   : > { %v1484_v7 = vadd.f32 0.0001, %v1474_v2  ;;  %v1517_v28 = vpop.permute.xlu0 %1516  ;;  %v1564_v29 = vunpack.c.0.s8 %v1563_v8 }
 0x3aa   : > { %1987 = vrsqrt.f32 %v1483_v5 }
 0x3ab   : > { %1989 = vrsqrt.f32 %v1484_v7 }
 0x3ac   : > { %v1549_v48 = vpop.permute.xlu1 %1548 }
 0x3ad   : > { %v1554_v52 = vrot.slane %v1549_v48, %v1553_v44 }
 0x3b4   : > { %v1988_v13 = vpop.eup %1987 }
 0x3b5   : > { %v1990_v12 = vpop.eup %1989  ;;  %v1487_v14 = vmul.f32 %v1988_v13, %v1475_v54  ;;  %v1489_v15 = vmul.f32 %v1988_v13, %v1477_v55  ;;  %v1491_v16 = vmul.f32 %v1988_v13, %v1479_v56  ;;  %v1493_v18 = vmul.f32 %v1988_v13, %v1481_v57 }
 0x3b6   : > { %v1488_v6 = vmul.f32 %v1990_v12, %v1476_v62  ;;  %v1490_v19 = vmul.f32 %v1990_v12, %v1478_v63  ;;  %v1492_v51 = vmul.f32 %v1990_v12, %v1480_v1  ;;  %v1494_v21 = vmul.f32 %v1990_v12, %v1482_v4 }
 0x3b7   : > { %v1519_v0 = vmul.f32 %v1502_v47, %v1487_v14  ;;  %v1521_v22 = vmul.f32 %v1507_v61, %v1489_v15  ;;  %v1523_v25 = vmul.f32 %v1512_v23, %v1491_v16  ;;  %v1525_v32 = vmul.f32 %v1517_v28, %v1493_v18 }
 0x3b8   : > { %v1520_v20 = vmul.f32 %v1502_v47, %v1488_v6  ;;  %v1522_v24 = vmul.f32 %v1507_v61, %v1490_v19  ;;  %v1524_v30 = vmul.f32 %v1512_v23, %v1492_v51  ;;  %v1526_v33 = vmul.f32 %v1517_v28, %v1494_v21 }
 0x3b9   : > { %v1527_v27 = vadd.f32 %v1521_v22, %v1519_v0  ;;  %v1567_v56 = vsub.s32 %v1564_v29, %v1552_v39 }
 0x3ba   : > { %v1536_v31 = vadd.f32 %v1522_v24, %v1520_v20 }
 0x3bb   : > { %v1528_v35 = vadd.f32 %v1527_v27, %v1523_v25 }
 0x3bc   : > { %v1537_v40 = vadd.f32 %v1536_v31, %v1524_v30 }
 0x3bd   : > { %v1529_v36 = vadd.f32 %v1528_v35, %v1525_v32 }
 0x3be   : > { %v1538_v37 = vadd.f32 %v1537_v40, %v1526_v33 }
 0x3bf   : > { %v1530_v38 = vrot.slane %v1529_v36, 4 }
 0x3c0   : > { %v1539_v11 = vrot.slane %v1538_v37, 4 }
 0x3c1   : > { %v1531_v41 = vadd.f32 %v1530_v38, %v1529_v36 }
 0x3c2   : > { %v1540_v42 = vadd.f32 %v1539_v11, %v1538_v37 }
 0x3c3   : > { %v1532_v3 = vrot.slane %v1531_v41, 2 }
 0x3c4   : > { %v1541_v43 = vrot.slane %v1540_v42, 2 }
 0x3c5   : > { %v1533_v46 = vadd.f32 %v1532_v3, %v1531_v41 }
 0x3c6   : > { %v1542_v49 = vadd.f32 %v1541_v43, %v1540_v42 }
 0x3c7   : > { %v1534_v50 = vrot.slane %v1533_v46, 1 }
 0x3c8   : > { %v1543_v10 = vrot.slane %v1542_v49, 1 }
 0x3c9   : > { %v1535_v53 = vadd.f32 %v1534_v50, %v1533_v46 }
 0x3ca   : > { %v1544_v26 = vadd.f32 %v1543_v10, %v1542_v49 }
 0x3cb   : > { %v1555_v54 = vadd.f32 %v1554_v52, %v1535_v53 }
 0x3cc   : > { %v1556_v55 = vadd.f32 %v1554_v52, %v1544_v26 }
 0x3cd   : > { %v1557_v57 = vsel %vm2357_vm0, %v1555_v54, 0.0 }
 0x3ce   : > { %v1558_v58 = vsel %vm2389_vm4, %v1556_v55, 0.0 }
 0x3cf   : > { %v1561_v59 = vcombine.low %v1557_v57, %v1558_v58 }
 0x3d1   : > { %v1568_v60 = vrot.slane %v1561_v59, %v1567_v56 }
 0x3d3   : > { %v1575_v62 = vrot.slane %v1568_v60, %v1567_v56 }
 0x3d5   : > { %1581 = vst.msk [vmem:[%s403_s19] sm:$0x3] %vm1579_vm9, %v1575_v62 }
 0x3d6   : > { %2072 = shalt.err (!%p2069_p7)
}
 0x3d7   : > { %s2073_s28 = scalar_lea.hbm %s2721_s14, 32  ;;  %s2077_s15 = scalar_lea.hbm %s2774_s10, 64 }
 0x3d8   : > { %p2074_p5 = scmp.ne.s32.totalorder %s2721_s14, %s2073_s28  ;;  %p2078_p1 = scmp.lt.u32.totalorder %s2721_s14, %s2774_s10 }
 0x3d9   : > { %p2079_p2 = scmp.lt.u32.totalorder %s2077_s15, %s2073_s28  ;;  %p2081_p9 = scmp.lt.u32.totalorder %s2073_s28, %s2721_s14 }
 0x3da   : > { %p2075_p10 = pnand %p2074_p5, %p2806_p8 }
 0x3db   : > { %p2080_p3 = por %p2079_p2, %p2078_p1 }
 0x3dc   : > { %p2076_p11 = pneg %p2075_p10 }
 0x3dd   : > { %p2082_p12 = por %p2081_p9, %p2080_p3 }
 0x3df   : > { %p2083_p13 = pnand %p2082_p12, %p2076_p11 }
 0x3e1   : > { %2086 = shalt.err (!%p2083_p13)
}
 0x3e2   : > { %1841 = dma.vmem_to_hbm [thread:$0]  (%p2806_p8), %s2723_s23, 32, %s2721_s14, %s1583_s26  }
 0x3e3 PF: > { %s2807_s27 = sld [smem:[#allocation18_spill]]  ;;  %s1609_s19 = sand.u32 1, %s2119_s0  }
 0x3e4   : > { %s1610_s25 = scalar_lea.sflag [#allocation8], %s1609_s19 }
 0x3e9   : > { %p2808_p0 = scmp.ne.s32.totalorder %s2807_s27, 0 }
 0x3eb   : > { %p1851_p4 = pnand %p1688_p6, %p2808_p0 }
 0x3ed   : > { %2114 = dma.done.wait (!%p1851_p4), %s1610_s25, 32  }
 0x3ee   : > { %2116 = vsyncadd (!%p1851_p4), %s1610_s25, 4294967264  ;;  %s2809_s21 = sld [smem:[#allocation16_spill]]  ;;  %s2810_s30 = sld [smem:[#allocation17_spill]] }
 0x3ef   : > { %s2811_s0 = smov %s2123_s9  ;;  %s2812_s9 = smov %s2127_s20 }
 0x3f4   : > { %p30_p7 = scmp.ge.s32.totalorder %s2809_s21, 4   ;;  %s2813_s20 = smov %s2810_s30 }
 0x3f6   :  { %32 = sbr.rel (!%p30_p7) target bundleno = 20 (0x14), region = 132 }
 0x3fd   :  { %1615 = vsyncpa [#allocation7], 1 }
 0x3fe   :  { %1617 = vsyncpa [#allocation7 + $0x1], 1 }
 0x3ff   :  { %1618 = vsyncpa [#allocation10], 1 }
 0x400   :  { %1619 = vsyncpa [#allocation8], 1 }
 0x401   :  { %1621 = vsyncpa [#allocation8 + $0x1], 1 }

</bundles_post_ra>
